<compile_context>
chip_gen: v5e
topology: v5e:2x2
jax: 0.10.0
libtpu: 0.0.40
codegen_flags: <defaults>
</compile_context>

<pallas_src>
import math

import jax
import jax.numpy as jnp
from jax.experimental import pallas as pl
from jax.experimental.pallas import tpu as pltpu


# ---------------------------------------------------------------------------
# kernel
# ---------------------------------------------------------------------------
def _make_kernel(B, S1, Sk1, S2, Sg, out_dim):
    f32 = jnp.float32
    bf16 = jnp.bfloat16

    def kernel(q1_ref, k1_ref, v1_ref, q2_ref, kg_ref,
               w5_ref, wkv2_ref, b_ref,
               o1_ref, o2_ref):
        bias = b_ref[...]                                  # (8, out) f32

        def proj(x_ref, wi, bi):
            # (B*S, d_in) bf16 @ (d_in, out) bf16 -> f32, + bias row (f32)
            return (jnp.dot(x_ref[...], w5_ref[wi],
                            preferred_element_type=f32)
                    + bias[bi:bi + 1, :])

        # ---------------- attention1 (image stream) projections ------------
        # 1/sqrt(out_dim) is pre-folded into w5[0] / bias[0].
        q1 = proj(q1_ref, 0, 0)                            # (B*S1,  out)
        k1 = proj(k1_ref, 1, 1)                            # (B*Sk1, out)
        v1 = proj(v1_ref, 2, 2)                            # (B*Sk1, out)

        # ------------- gene adjust + attention2 projections ---------------
        adj = proj(kg_ref, 3, 3)                           # (B*Sg, out)
        q2 = proj(q2_ref, 4, 4)                            # (B*S2, out)  (scaled)
        # k2 || v2 in one matmul (shared LHS push), then static lane slices.
        kv = jnp.dot(adj.astype(bf16), wkv2_ref[...],
                     preferred_element_type=f32)           # (B*Sg, 2*out)
        k2 = kv[:, :out_dim] + bias[5:6, :]
        v2 = kv[:, out_dim:] + bias[6:7, :]

        def attend(q, k, v, o_ref, sq, sk):
            # Per-batch (S, S) attention; B is tiny & static -> unrolled.
            for b in range(B):
                qb = q[b * sq:(b + 1) * sq]
                kb = k[b * sk:(b + 1) * sk]
                vb = v[b * sk:(b + 1) * sk]
                # q @ k^T without materializing a transpose.
                s = jax.lax.dot_general(
                    qb, kb, (((1,), (1,)), ((), ())),
                    preferred_element_type=f32)            # (sq, sk)
                s = s - jnp.max(s, axis=-1, keepdims=True)
                p = jnp.exp(s)
                p = p * pl.reciprocal(
                    jnp.sum(p, axis=-1, keepdims=True), approx=True)
                o_ref[b * sq:(b + 1) * sq, :] = jnp.dot(
                    p, vb, preferred_element_type=f32).astype(o_ref.dtype)

        attend(q1, k1, v1, o1_ref, S1, Sk1)
        attend(q2, k2, v2, o2_ref, S2, Sg)

    return kernel


# ---------------------------------------------------------------------------
# one-time weight preparation (hoisted out of the forward path)
# ---------------------------------------------------------------------------
def prepare_params(params, img_dim, gene_dim, out_dim):
    """Transpose / pad / scale-fold / pack / cast all weights ONCE."""
    f32, bf16 = jnp.float32, jnp.bfloat16
    inv_scale = 1.0 / math.sqrt(out_dim)

    # Common padded input width (lane-aligned).
    d_in = max(img_dim, gene_dim, out_dim)
    d_in = ((d_in + 127) // 128) * 128

    def prep_w(w, scale=1.0):
        w = w.T.astype(f32) * scale                        # (in, out)
        pad = d_in - w.shape[0]
        if pad:
            w = jnp.pad(w, ((0, pad), (0, 0)))
        return w

    wq1 = prep_w(params["wq1"], inv_scale)
    wk1 = prep_w(params["wk1"])
    wv1 = prep_w(params["wv1"])
    wg = prep_w(params["wg"])
    wq2 = prep_w(params["wq2"], inv_scale)
    w5 = jnp.stack([wq1, wk1, wv1, wg, wq2]).astype(bf16)  # (5, d_in, out)

    wkv2 = jnp.concatenate(
        [params["wk2"].T.astype(f32), params["wv2"].T.astype(f32)],
        axis=1).astype(bf16)                               # (out, 2*out)

    biases = [params["bq1"].astype(f32) * inv_scale,
              params["bk1"].astype(f32),
              params["bv1"].astype(f32),
              params["bg"].astype(f32),
              params["bq2"].astype(f32) * inv_scale,
              params["bk2"].astype(f32),
              params["bv2"].astype(f32),
              jnp.zeros((out_dim,), f32)]
    bstack = jnp.stack(biases)                             # (8, out) f32

    return {"w5": w5, "wkv2": wkv2, "bstack": bstack,
            "d_in": d_in, "out_dim": out_dim}


# ---------------------------------------------------------------------------
# forward wrapper
# ---------------------------------------------------------------------------
def dual_cross_attention2(query1, key1, value1, query2, key2, value2, prepared):
    """Fused Pallas forward of DualCrossAttention2 (prepared weights)."""
    del value2  # unused by DualCrossAttention2.forward (matches the module)

    B, S1, _ = query1.shape
    _, Sk1, _ = key1.shape
    _, S2, _ = query2.shape
    _, Sg, _ = key2.shape
    d_in = prepared["d_in"]
    out_dim = prepared["out_dim"]
    f32, bf16 = jnp.float32, jnp.bfloat16

    def fold(x):
        # (B, S, d) -> (B*S, d_in) bf16; zero-pad feature dim if needed.
        b, s, d = x.shape
        if d != d_in:
            x = jnp.pad(x, ((0, 0), (0, 0), (0, d_in - d)))
        return x.reshape(b * s, d_in).astype(bf16)

    q1 = fold(query1)
    k1 = fold(key1)
    v1 = fold(value1)
    q2 = fold(query2)
    kg = fold(key2)
    w5 = prepared["w5"]
    wkv2 = prepared["wkv2"]
    bst = prepared["bstack"]

    def full_spec(arr):
        n = arr.ndim
        return pl.BlockSpec(arr.shape, lambda i, _n=n: (0,) * _n)

    in_specs = [full_spec(q1), full_spec(k1), full_spec(v1),
                full_spec(q2), full_spec(kg),
                full_spec(w5), full_spec(wkv2), full_spec(bst)]
    out_specs = [pl.BlockSpec((B * S1, out_dim), lambda i: (0, 0)),
                 pl.BlockSpec((B * S2, out_dim), lambda i: (0, 0))]

    kernel = _make_kernel(B, S1, Sk1, S2, Sg, out_dim)

    o1, o2 = pl.pallas_call(
        kernel,
        out_shape=(jax.ShapeDtypeStruct((B * S1, out_dim), f32),
                   jax.ShapeDtypeStruct((B * S2, out_dim), f32)),
        grid=(1,),
        in_specs=in_specs,
        out_specs=out_specs,
        compiler_params=pltpu.CompilerParams(
            dimension_semantics=("arbitrary",)),
    )(q1, k1, v1, q2, kg, w5, wkv2, bst)

    return o1.reshape(B, S1, out_dim), o2.reshape(B, S2, out_dim)


# ---------------------------------------------------------------------------
# pure-JAX reference (mirrors the PyTorch forward) for a correctness check
# ---------------------------------------------------------------------------
_HI = jax.lax.Precision.HIGHEST


def _ref_dual_cross_attention2(query1, key1, value1, query2, key2, value2, p):
    del value2  # unused by the module

    def linear(x, w, b):
        return jnp.matmul(x, w.T, precision=_HI) + b

    def sdpa(q, k, v, wq, bq, wk, bk, wv, bv, out_dim):
        qq = linear(q, wq, bq)
        kk = linear(k, wk, bk)
        vv = linear(v, wv, bv)
        s = jnp.matmul(qq, jnp.swapaxes(kk, -2, -1),
                       precision=_HI) / math.sqrt(out_dim)
        a = jax.nn.softmax(s, axis=-1)
        return jnp.matmul(a, vv, precision=_HI)

    out_dim = p["wq1"].shape[0]
    attended1 = sdpa(query1, key1, value1,
                     p["wq1"], p["bq1"], p["wk1"], p["bk1"], p["wv1"], p["bv1"],
                     out_dim)
    adjusted = linear(key2, p["wg"], p["bg"])
    attended2 = sdpa(query2, adjusted, adjusted,
                     p["wq2"], p["bq2"], p["wk2"], p["bk2"], p["wv2"], p["bv2"],
                     out_dim)
    return attended1, attended2


def _init_params(key, img_dim, gene_dim, out_dim):
    ks = jax.random.split(key, 14)

    def lin_init(kw, kb, out_f, in_f):
        bound = 1.0 / math.sqrt(in_f)
        w = jax.random.uniform(kw, (out_f, in_f), jnp.float32, -bound, bound)
        b = jax.random.uniform(kb, (out_f,), jnp.float32, -bound, bound)
        return w, b

    wq1, bq1 = lin_init(ks[0], ks[1], out_dim, img_dim)
    wk1, bk1 = lin_init(ks[2], ks[3], out_dim, img_dim)
    wv1, bv1 = lin_init(ks[4], ks[5], out_dim, img_dim)
    wg, bg = lin_init(ks[6], ks[7], out_dim, gene_dim)
    wq2, bq2 = lin_init(ks[8], ks[9], out_dim, out_dim)
    wk2, bk2 = lin_init(ks[10], ks[11], out_dim, out_dim)
    wv2, bv2 = lin_init(ks[12], ks[13], out_dim, out_dim)
    return dict(wq1=wq1, bq1=bq1, wk1=wk1, bk1=bk1, wv1=wv1, bv1=bv1,
                wg=wg, bg=bg,
                wq2=wq2, bq2=bq2, wk2=wk2, bk2=bk2, wv2=wv2, bv2=bv2)


if __name__ == "__main__":
    # DualCrossAttention2(img_dim=256, gene_dim=138, output_dim=256)
    B, S1, SK1, S2, SG = 2, 8, 8, 8, 8
    IMG_DIM, GENE_DIM, OUT_DIM = 256, 138, 256

    key = jax.random.PRNGKey(0)
    kq1, kk1, kv1, kq2, kk2, kv2, kp = jax.random.split(key, 7)
    query1 = jax.random.normal(kq1, (B, S1, IMG_DIM), jnp.float32)
    key1 = jax.random.normal(kk1, (B, SK1, IMG_DIM), jnp.float32)
    value1 = jax.random.normal(kv1, (B, SK1, IMG_DIM), jnp.float32)
    query2 = jax.random.normal(kq2, (B, S2, OUT_DIM), jnp.float32)
    key2 = jax.random.normal(kk2, (B, SG, GENE_DIM), jnp.float32)
    value2 = jax.random.normal(kv2, (B, SG, OUT_DIM), jnp.float32)  # unused
    params = _init_params(kp, IMG_DIM, GENE_DIM, OUT_DIM)

    # Weight prep (transpose / pad / pack / bf16 cast) happens ONCE here,
    # outside the jitted forward path.
    prepared = prepare_params(params, IMG_DIM, GENE_DIM, OUT_DIM)

    fwd = jax.jit(lambda q1, k1, v1, q2, k2, v2:
                  dual_cross_attention2(q1, k1, v1, q2, k2, v2, prepared))

    out1, out2 = fwd(query1, key1, value1, query2, key2, value2)
    out1 = jax.block_until_ready(out1)
    out2 = jax.block_until_ready(out2)
    assert out1.shape == (B, S1, OUT_DIM)
    assert out2.shape == (B, S2, OUT_DIM)

    ref1, ref2 = _ref_dual_cross_attention2(query1, key1, value1,
                                            query2, key2, value2, params)
    # Tolerance absorbs bf16 weights/activations + single-pass MXU f32 accum
    # vs the HIGHEST-precision XLA reference; semantic bugs would be O(1).
    assert jnp.allclose(out1, ref1, rtol=1e-2, atol=1e-2), "attended1 mismatch vs reference"
    assert jnp.allclose(out2, ref2, rtol=1e-2, atol=1e-2), "attended2 mismatch vs reference"

    print("KERNEL_OK")
</pallas_src>

<mosaic_0001>
module attributes {stable_mosaic.version = 11 : i64} {
  func.func @kernel(%arg0: i32, %arg1: memref<16x256xbf16, #tpu.memory_space<vmem>>, %arg2: memref<16x256xbf16, #tpu.memory_space<vmem>>, %arg3: memref<16x256xbf16, #tpu.memory_space<vmem>>, %arg4: memref<16x256xbf16, #tpu.memory_space<vmem>>, %arg5: memref<16x256xbf16, #tpu.memory_space<vmem>>, %arg6: memref<5x256x256xbf16, #tpu.memory_space<vmem>>, %arg7: memref<256x512xbf16, #tpu.memory_space<vmem>>, %arg8: memref<8x256xf32, #tpu.memory_space<vmem>>, %arg9: memref<16x256xf32, #tpu.memory_space<vmem>>, %arg10: memref<16x256xf32, #tpu.memory_space<vmem>>) attributes {dimension_semantics = [#tpu.dimension_semantics<arbitrary>], iteration_bounds = array<i64: 1>, scalar_prefetch = 0 : i64, scratch_operands = 0 : i64, tpu.core_type = #tpu.core_type<tc>, window_params = [{pipeline_mode = #tpu.pipeline_mode<synchronous>, transform_indices = @transform_0, window_bounds = array<i64: 16, 256>}, {pipeline_mode = #tpu.pipeline_mode<synchronous>, transform_indices = @transform_1, window_bounds = array<i64: 16, 256>}, {pipeline_mode = #tpu.pipeline_mode<synchronous>, transform_indices = @transform_2, window_bounds = array<i64: 16, 256>}, {pipeline_mode = #tpu.pipeline_mode<synchronous>, transform_indices = @transform_3, window_bounds = array<i64: 16, 256>}, {pipeline_mode = #tpu.pipeline_mode<synchronous>, transform_indices = @transform_4, window_bounds = array<i64: 16, 256>}, {pipeline_mode = #tpu.pipeline_mode<synchronous>, transform_indices = @transform_5, window_bounds = array<i64: 5, 256, 256>}, {pipeline_mode = #tpu.pipeline_mode<synchronous>, transform_indices = @transform_6, window_bounds = array<i64: 256, 512>}, {pipeline_mode = #tpu.pipeline_mode<synchronous>, transform_indices = @transform_7, window_bounds = array<i64: 8, 256>}, {pipeline_mode = #tpu.pipeline_mode<synchronous>, transform_indices = @transform_8, window_bounds = array<i64: 16, 256>}, {pipeline_mode = #tpu.pipeline_mode<synchronous>, transform_indices = @transform_9, window_bounds = array<i64: 16, 256>}]} {
    %c0 = arith.constant 0 : index
    %c0_0 = arith.constant 0 : index
    %0 = vector.load %arg8[%c0, %c0_0] : memref<8x256xf32, #tpu.memory_space<vmem>>, vector<8x256xf32>
    %c0_1 = arith.constant 0 : index
    %c0_2 = arith.constant 0 : index
    %1 = vector.load %arg1[%c0_1, %c0_2] : memref<16x256xbf16, #tpu.memory_space<vmem>>, vector<16x256xbf16>
    %c0_3 = arith.constant 0 : index
    %c0_4 = arith.constant 0 : index
    %c0_5 = arith.constant 0 : index
    %2 = vector.load %arg6[%c0_3, %c0_4, %c0_5] : memref<5x256x256xbf16, #tpu.memory_space<vmem>>, vector<1x256x256xbf16>
    %3 = vector.shape_cast %2 : vector<1x256x256xbf16> to vector<256x256xbf16>
    %cst = arith.constant dense<0.000000e+00> : vector<16x256xf32>
    %4 = tpu.matmul %1, %3, %cst {dimension_numbers = #tpu.dot_dimension_numbers<[1], [0], [0], [1], [0, 0, 1, 1], [], []>} : vector<16x256xbf16>, vector<256x256xbf16>, vector<16x256xf32> -> vector<16x256xf32>
    %5 = vector.extract_strided_slice %0 {offsets = [0, 0], sizes = [1, 256], strides = [1, 1]} : vector<8x256xf32> to vector<1x256xf32>
    %6 = vector.broadcast %5 : vector<1x256xf32> to vector<16x256xf32>
    %7 = arith.addf %4, %6 : vector<16x256xf32>
    %c0_6 = arith.constant 0 : index
    %c0_7 = arith.constant 0 : index
    %8 = vector.load %arg2[%c0_6, %c0_7] : memref<16x256xbf16, #tpu.memory_space<vmem>>, vector<16x256xbf16>
    %c1 = arith.constant 1 : index
    %c0_8 = arith.constant 0 : index
    %c0_9 = arith.constant 0 : index
    %9 = vector.load %arg6[%c1, %c0_8, %c0_9] : memref<5x256x256xbf16, #tpu.memory_space<vmem>>, vector<1x256x256xbf16>
    %10 = vector.shape_cast %9 : vector<1x256x256xbf16> to vector<256x256xbf16>
    %cst_10 = arith.constant dense<0.000000e+00> : vector<16x256xf32>
    %11 = tpu.matmul %8, %10, %cst_10 {dimension_numbers = #tpu.dot_dimension_numbers<[1], [0], [0], [1], [0, 0, 1, 1], [], []>} : vector<16x256xbf16>, vector<256x256xbf16>, vector<16x256xf32> -> vector<16x256xf32>
    %12 = vector.extract_strided_slice %0 {offsets = [1, 0], sizes = [1, 256], strides = [1, 1]} : vector<8x256xf32> to vector<1x256xf32>
    %13 = vector.broadcast %12 : vector<1x256xf32> to vector<16x256xf32>
    %14 = arith.addf %11, %13 : vector<16x256xf32>
    %c0_11 = arith.constant 0 : index
    %c0_12 = arith.constant 0 : index
    %15 = vector.load %arg3[%c0_11, %c0_12] : memref<16x256xbf16, #tpu.memory_space<vmem>>, vector<16x256xbf16>
    %c2 = arith.constant 2 : index
    %c0_13 = arith.constant 0 : index
    %c0_14 = arith.constant 0 : index
    %16 = vector.load %arg6[%c2, %c0_13, %c0_14] : memref<5x256x256xbf16, #tpu.memory_space<vmem>>, vector<1x256x256xbf16>
    %17 = vector.shape_cast %16 : vector<1x256x256xbf16> to vector<256x256xbf16>
    %cst_15 = arith.constant dense<0.000000e+00> : vector<16x256xf32>
    %18 = tpu.matmul %15, %17, %cst_15 {dimension_numbers = #tpu.dot_dimension_numbers<[1], [0], [0], [1], [0, 0, 1, 1], [], []>} : vector<16x256xbf16>, vector<256x256xbf16>, vector<16x256xf32> -> vector<16x256xf32>
    %19 = vector.extract_strided_slice %0 {offsets = [2, 0], sizes = [1, 256], strides = [1, 1]} : vector<8x256xf32> to vector<1x256xf32>
    %20 = vector.broadcast %19 : vector<1x256xf32> to vector<16x256xf32>
    %21 = arith.addf %18, %20 : vector<16x256xf32>
    %c0_16 = arith.constant 0 : index
    %c0_17 = arith.constant 0 : index
    %22 = vector.load %arg5[%c0_16, %c0_17] : memref<16x256xbf16, #tpu.memory_space<vmem>>, vector<16x256xbf16>
    %c3 = arith.constant 3 : index
    %c0_18 = arith.constant 0 : index
    %c0_19 = arith.constant 0 : index
    %23 = vector.load %arg6[%c3, %c0_18, %c0_19] : memref<5x256x256xbf16, #tpu.memory_space<vmem>>, vector<1x256x256xbf16>
    %24 = vector.shape_cast %23 : vector<1x256x256xbf16> to vector<256x256xbf16>
    %cst_20 = arith.constant dense<0.000000e+00> : vector<16x256xf32>
    %25 = tpu.matmul %22, %24, %cst_20 {dimension_numbers = #tpu.dot_dimension_numbers<[1], [0], [0], [1], [0, 0, 1, 1], [], []>} : vector<16x256xbf16>, vector<256x256xbf16>, vector<16x256xf32> -> vector<16x256xf32>
    %26 = vector.extract_strided_slice %0 {offsets = [3, 0], sizes = [1, 256], strides = [1, 1]} : vector<8x256xf32> to vector<1x256xf32>
    %27 = vector.broadcast %26 : vector<1x256xf32> to vector<16x256xf32>
    %28 = arith.addf %25, %27 : vector<16x256xf32>
    %c0_21 = arith.constant 0 : index
    %c0_22 = arith.constant 0 : index
    %29 = vector.load %arg4[%c0_21, %c0_22] : memref<16x256xbf16, #tpu.memory_space<vmem>>, vector<16x256xbf16>
    %c4 = arith.constant 4 : index
    %c0_23 = arith.constant 0 : index
    %c0_24 = arith.constant 0 : index
    %30 = vector.load %arg6[%c4, %c0_23, %c0_24] : memref<5x256x256xbf16, #tpu.memory_space<vmem>>, vector<1x256x256xbf16>
    %31 = vector.shape_cast %30 : vector<1x256x256xbf16> to vector<256x256xbf16>
    %cst_25 = arith.constant dense<0.000000e+00> : vector<16x256xf32>
    %32 = tpu.matmul %29, %31, %cst_25 {dimension_numbers = #tpu.dot_dimension_numbers<[1], [0], [0], [1], [0, 0, 1, 1], [], []>} : vector<16x256xbf16>, vector<256x256xbf16>, vector<16x256xf32> -> vector<16x256xf32>
    %33 = vector.extract_strided_slice %0 {offsets = [4, 0], sizes = [1, 256], strides = [1, 1]} : vector<8x256xf32> to vector<1x256xf32>
    %34 = vector.broadcast %33 : vector<1x256xf32> to vector<16x256xf32>
    %35 = arith.addf %32, %34 : vector<16x256xf32>
    %36 = arith.truncf %28 : vector<16x256xf32> to vector<16x256xbf16>
    %c0_26 = arith.constant 0 : index
    %c0_27 = arith.constant 0 : index
    %37 = vector.load %arg7[%c0_26, %c0_27] : memref<256x512xbf16, #tpu.memory_space<vmem>>, vector<256x512xbf16>
    %cst_28 = arith.constant dense<0.000000e+00> : vector<16x512xf32>
    %38 = tpu.matmul %36, %37, %cst_28 {dimension_numbers = #tpu.dot_dimension_numbers<[1], [0], [0], [1], [0, 0, 1, 1], [], []>} : vector<16x256xbf16>, vector<256x512xbf16>, vector<16x512xf32> -> vector<16x512xf32>
    %39 = vector.extract_strided_slice %38 {offsets = [0, 0], sizes = [16, 256], strides = [1, 1]} : vector<16x512xf32> to vector<16x256xf32>
    %40 = vector.extract_strided_slice %0 {offsets = [5, 0], sizes = [1, 256], strides = [1, 1]} : vector<8x256xf32> to vector<1x256xf32>
    %41 = vector.broadcast %40 : vector<1x256xf32> to vector<16x256xf32>
    %42 = arith.addf %39, %41 : vector<16x256xf32>
    %43 = vector.extract_strided_slice %38 {offsets = [0, 256], sizes = [16, 256], strides = [1, 1]} : vector<16x512xf32> to vector<16x256xf32>
    %44 = vector.extract_strided_slice %0 {offsets = [6, 0], sizes = [1, 256], strides = [1, 1]} : vector<8x256xf32> to vector<1x256xf32>
    %45 = vector.broadcast %44 : vector<1x256xf32> to vector<16x256xf32>
    %46 = arith.addf %43, %45 : vector<16x256xf32>
    %47 = vector.extract_strided_slice %7 {offsets = [0, 0], sizes = [8, 256], strides = [1, 1]} : vector<16x256xf32> to vector<8x256xf32>
    %48 = vector.extract_strided_slice %14 {offsets = [0, 0], sizes = [8, 256], strides = [1, 1]} : vector<16x256xf32> to vector<8x256xf32>
    %49 = vector.extract_strided_slice %21 {offsets = [0, 0], sizes = [8, 256], strides = [1, 1]} : vector<16x256xf32> to vector<8x256xf32>
    %cst_29 = arith.constant dense<0.000000e+00> : vector<8x8xf32>
    %50 = tpu.matmul %47, %48, %cst_29 {dimension_numbers = #tpu.dot_dimension_numbers<[1], [1], [0], [0], [0, 0, 1, 0], [], []>} : vector<8x256xf32>, vector<8x256xf32>, vector<8x8xf32> -> vector<8x8xf32>
    %cst_30 = arith.constant dense<0xFF800000> : vector<8xf32>
    %51 = vector.multi_reduction <maximumf>, %50, %cst_30 [1] : vector<8x8xf32> to vector<8xf32>
    %52 = vector.shape_cast %51 : vector<8xf32> to vector<8x1xf32>
    %53 = vector.broadcast %52 : vector<8x1xf32> to vector<8x8xf32>
    %54 = arith.subf %50, %53 : vector<8x8xf32>
    %55 = math.exp %54 : vector<8x8xf32>
    %cst_31 = arith.constant dense<0.000000e+00> : vector<8xf32>
    %56 = vector.multi_reduction <add>, %55, %cst_31 [1] : vector<8x8xf32> to vector<8xf32>
    %57 = vector.shape_cast %56 : vector<8xf32> to vector<8x1xf32>
    %58 = tpu.reciprocal %57 {approx = true} : vector<8x1xf32> -> vector<8x1xf32>
    %59 = vector.broadcast %58 : vector<8x1xf32> to vector<8x8xf32>
    %60 = arith.mulf %55, %59 : vector<8x8xf32>
    %cst_32 = arith.constant dense<0.000000e+00> : vector<8x256xf32>
    %61 = tpu.matmul %60, %49, %cst_32 {dimension_numbers = #tpu.dot_dimension_numbers<[1], [0], [0], [1], [0, 0, 1, 1], [], []>} : vector<8x8xf32>, vector<8x256xf32>, vector<8x256xf32> -> vector<8x256xf32>
    %c0_33 = arith.constant 0 : index
    %c0_34 = arith.constant 0 : index
    %62 = vector.load %arg9[%c0_33, %c0_34] : memref<16x256xf32, #tpu.memory_space<vmem>>, vector<8x256xf32>
    tpu.vector_store %arg9[%c0_33, %c0_34], %61 {strides = array<i32>} : memref<16x256xf32, #tpu.memory_space<vmem>>, vector<8x256xf32>,
    %63 = vector.extract_strided_slice %7 {offsets = [8, 0], sizes = [8, 256], strides = [1, 1]} : vector<16x256xf32> to vector<8x256xf32>
    %64 = vector.extract_strided_slice %14 {offsets = [8, 0], sizes = [8, 256], strides = [1, 1]} : vector<16x256xf32> to vector<8x256xf32>
    %65 = vector.extract_strided_slice %21 {offsets = [8, 0], sizes = [8, 256], strides = [1, 1]} : vector<16x256xf32> to vector<8x256xf32>
    %cst_35 = arith.constant dense<0.000000e+00> : vector<8x8xf32>
    %66 = tpu.matmul %63, %64, %cst_35 {dimension_numbers = #tpu.dot_dimension_numbers<[1], [1], [0], [0], [0, 0, 1, 0], [], []>} : vector<8x256xf32>, vector<8x256xf32>, vector<8x8xf32> -> vector<8x8xf32>
    %cst_36 = arith.constant dense<0xFF800000> : vector<8xf32>
    %67 = vector.multi_reduction <maximumf>, %66, %cst_36 [1] : vector<8x8xf32> to vector<8xf32>
    %68 = vector.shape_cast %67 : vector<8xf32> to vector<8x1xf32>
    %69 = vector.broadcast %68 : vector<8x1xf32> to vector<8x8xf32>
    %70 = arith.subf %66, %69 : vector<8x8xf32>
    %71 = math.exp %70 : vector<8x8xf32>
    %cst_37 = arith.constant dense<0.000000e+00> : vector<8xf32>
    %72 = vector.multi_reduction <add>, %71, %cst_37 [1] : vector<8x8xf32> to vector<8xf32>
    %73 = vector.shape_cast %72 : vector<8xf32> to vector<8x1xf32>
    %74 = tpu.reciprocal %73 {approx = true} : vector<8x1xf32> -> vector<8x1xf32>
    %75 = vector.broadcast %74 : vector<8x1xf32> to vector<8x8xf32>
    %76 = arith.mulf %71, %75 : vector<8x8xf32>
    %cst_38 = arith.constant dense<0.000000e+00> : vector<8x256xf32>
    %77 = tpu.matmul %76, %65, %cst_38 {dimension_numbers = #tpu.dot_dimension_numbers<[1], [0], [0], [1], [0, 0, 1, 1], [], []>} : vector<8x8xf32>, vector<8x256xf32>, vector<8x256xf32> -> vector<8x256xf32>
    %c8 = arith.constant 8 : index
    %c0_39 = arith.constant 0 : index
    %78 = vector.load %arg9[%c8, %c0_39] : memref<16x256xf32, #tpu.memory_space<vmem>>, vector<8x256xf32>
    tpu.vector_store %arg9[%c8, %c0_39], %77 {strides = array<i32>} : memref<16x256xf32, #tpu.memory_space<vmem>>, vector<8x256xf32>,
    %79 = vector.extract_strided_slice %35 {offsets = [0, 0], sizes = [8, 256], strides = [1, 1]} : vector<16x256xf32> to vector<8x256xf32>
    %80 = vector.extract_strided_slice %42 {offsets = [0, 0], sizes = [8, 256], strides = [1, 1]} : vector<16x256xf32> to vector<8x256xf32>
    %81 = vector.extract_strided_slice %46 {offsets = [0, 0], sizes = [8, 256], strides = [1, 1]} : vector<16x256xf32> to vector<8x256xf32>
    %cst_40 = arith.constant dense<0.000000e+00> : vector<8x8xf32>
    %82 = tpu.matmul %79, %80, %cst_40 {dimension_numbers = #tpu.dot_dimension_numbers<[1], [1], [0], [0], [0, 0, 1, 0], [], []>} : vector<8x256xf32>, vector<8x256xf32>, vector<8x8xf32> -> vector<8x8xf32>
    %cst_41 = arith.constant dense<0xFF800000> : vector<8xf32>
    %83 = vector.multi_reduction <maximumf>, %82, %cst_41 [1] : vector<8x8xf32> to vector<8xf32>
    %84 = vector.shape_cast %83 : vector<8xf32> to vector<8x1xf32>
    %85 = vector.broadcast %84 : vector<8x1xf32> to vector<8x8xf32>
    %86 = arith.subf %82, %85 : vector<8x8xf32>
    %87 = math.exp %86 : vector<8x8xf32>
    %cst_42 = arith.constant dense<0.000000e+00> : vector<8xf32>
    %88 = vector.multi_reduction <add>, %87, %cst_42 [1] : vector<8x8xf32> to vector<8xf32>
    %89 = vector.shape_cast %88 : vector<8xf32> to vector<8x1xf32>
    %90 = tpu.reciprocal %89 {approx = true} : vector<8x1xf32> -> vector<8x1xf32>
    %91 = vector.broadcast %90 : vector<8x1xf32> to vector<8x8xf32>
    %92 = arith.mulf %87, %91 : vector<8x8xf32>
    %cst_43 = arith.constant dense<0.000000e+00> : vector<8x256xf32>
    %93 = tpu.matmul %92, %81, %cst_43 {dimension_numbers = #tpu.dot_dimension_numbers<[1], [0], [0], [1], [0, 0, 1, 1], [], []>} : vector<8x8xf32>, vector<8x256xf32>, vector<8x256xf32> -> vector<8x256xf32>
    %c0_44 = arith.constant 0 : index
    %c0_45 = arith.constant 0 : index
    %94 = vector.load %arg10[%c0_44, %c0_45] : memref<16x256xf32, #tpu.memory_space<vmem>>, vector<8x256xf32>
    tpu.vector_store %arg10[%c0_44, %c0_45], %93 {strides = array<i32>} : memref<16x256xf32, #tpu.memory_space<vmem>>, vector<8x256xf32>,
    %95 = vector.extract_strided_slice %35 {offsets = [8, 0], sizes = [8, 256], strides = [1, 1]} : vector<16x256xf32> to vector<8x256xf32>
    %96 = vector.extract_strided_slice %42 {offsets = [8, 0], sizes = [8, 256], strides = [1, 1]} : vector<16x256xf32> to vector<8x256xf32>
    %97 = vector.extract_strided_slice %46 {offsets = [8, 0], sizes = [8, 256], strides = [1, 1]} : vector<16x256xf32> to vector<8x256xf32>
    %cst_46 = arith.constant dense<0.000000e+00> : vector<8x8xf32>
    %98 = tpu.matmul %95, %96, %cst_46 {dimension_numbers = #tpu.dot_dimension_numbers<[1], [1], [0], [0], [0, 0, 1, 0], [], []>} : vector<8x256xf32>, vector<8x256xf32>, vector<8x8xf32> -> vector<8x8xf32>
    %cst_47 = arith.constant dense<0xFF800000> : vector<8xf32>
    %99 = vector.multi_reduction <maximumf>, %98, %cst_47 [1] : vector<8x8xf32> to vector<8xf32>
    %100 = vector.shape_cast %99 : vector<8xf32> to vector<8x1xf32>
    %101 = vector.broadcast %100 : vector<8x1xf32> to vector<8x8xf32>
    %102 = arith.subf %98, %101 : vector<8x8xf32>
    %103 = math.exp %102 : vector<8x8xf32>
    %cst_48 = arith.constant dense<0.000000e+00> : vector<8xf32>
    %104 = vector.multi_reduction <add>, %103, %cst_48 [1] : vector<8x8xf32> to vector<8xf32>
    %105 = vector.shape_cast %104 : vector<8xf32> to vector<8x1xf32>
    %106 = tpu.reciprocal %105 {approx = true} : vector<8x1xf32> -> vector<8x1xf32>
    %107 = vector.broadcast %106 : vector<8x1xf32> to vector<8x8xf32>
    %108 = arith.mulf %103, %107 : vector<8x8xf32>
    %cst_49 = arith.constant dense<0.000000e+00> : vector<8x256xf32>
    %109 = tpu.matmul %108, %97, %cst_49 {dimension_numbers = #tpu.dot_dimension_numbers<[1], [0], [0], [1], [0, 0, 1, 1], [], []>} : vector<8x8xf32>, vector<8x256xf32>, vector<8x256xf32> -> vector<8x256xf32>
    %c8_50 = arith.constant 8 : index
    %c0_51 = arith.constant 0 : index
    %110 = vector.load %arg10[%c8_50, %c0_51] : memref<16x256xf32, #tpu.memory_space<vmem>>, vector<8x256xf32>
    tpu.vector_store %arg10[%c8_50, %c0_51], %109 {strides = array<i32>} : memref<16x256xf32, #tpu.memory_space<vmem>>, vector<8x256xf32>,
    return
  }
  func.func @transform_0(%arg0: i32) -> (i32, i32) {
    %c0_i32 = arith.constant 0 : i32
    %c0_i32_0 = arith.constant 0 : i32
    %c0_i32_1 = arith.constant 0 : i32
    return %c0_i32, %c0_i32_0 : i32, i32
  }
  func.func @transform_1(%arg0: i32) -> (i32, i32) {
    %c0_i32 = arith.constant 0 : i32
    %c0_i32_0 = arith.constant 0 : i32
    %c0_i32_1 = arith.constant 0 : i32
    return %c0_i32, %c0_i32_0 : i32, i32
  }
  func.func @transform_2(%arg0: i32) -> (i32, i32) {
    %c0_i32 = arith.constant 0 : i32
    %c0_i32_0 = arith.constant 0 : i32
    %c0_i32_1 = arith.constant 0 : i32
    return %c0_i32, %c0_i32_0 : i32, i32
  }
  func.func @transform_3(%arg0: i32) -> (i32, i32) {
    %c0_i32 = arith.constant 0 : i32
    %c0_i32_0 = arith.constant 0 : i32
    %c0_i32_1 = arith.constant 0 : i32
    return %c0_i32, %c0_i32_0 : i32, i32
  }
  func.func @transform_4(%arg0: i32) -> (i32, i32) {
    %c0_i32 = arith.constant 0 : i32
    %c0_i32_0 = arith.constant 0 : i32
    %c0_i32_1 = arith.constant 0 : i32
    return %c0_i32, %c0_i32_0 : i32, i32
  }
  func.func @transform_5(%arg0: i32) -> (i32, i32, i32) {
    %c0_i32 = arith.constant 0 : i32
    %c0_i32_0 = arith.constant 0 : i32
    %c0_i32_1 = arith.constant 0 : i32
    %c0_i32_2 = arith.constant 0 : i32
    return %c0_i32, %c0_i32_0, %c0_i32_1 : i32, i32, i32
  }
  func.func @transform_6(%arg0: i32) -> (i32, i32) {
    %c0_i32 = arith.constant 0 : i32
    %c0_i32_0 = arith.constant 0 : i32
    %c0_i32_1 = arith.constant 0 : i32
    return %c0_i32, %c0_i32_0 : i32, i32
  }
  func.func @transform_7(%arg0: i32) -> (i32, i32) {
    %c0_i32 = arith.constant 0 : i32
    %c0_i32_0 = arith.constant 0 : i32
    %c0_i32_1 = arith.constant 0 : i32
    return %c0_i32, %c0_i32_0 : i32, i32
  }
  func.func @transform_8(%arg0: i32) -> (i32, i32) {
    %c0_i32 = arith.constant 0 : i32
    %c0_i32_0 = arith.constant 0 : i32
    %c0_i32_1 = arith.constant 0 : i32
    return %c0_i32, %c0_i32_0 : i32, i32
  }
  func.func @transform_9(%arg0: i32) -> (i32, i32) {
    %c0_i32 = arith.constant 0 : i32
    %c0_i32_0 = arith.constant 0 : i32
    %c0_i32_1 = arith.constant 0 : i32
    return %c0_i32, %c0_i32_0 : i32, i32
  }
}

</mosaic_0001>

<bundles_post_ra>
// kernel: _lambda_.1
= control target key start
LH: loop header
LB: loop body
LE: loop exit
PB: predicated region body
PF: predicated region fallthrough
CT: control target
= control target key end

     0   :  { %15 = vsyncpa [#allocation3], 0  ;;  %s3848_s0 = inlined_call_operand.vmem [shape: bf16[16,256], index: 0, kind: input, shape index: {}]   ;;  %s3849_s1 = inlined_call_operand.vmem [shape: bf16[16,256], index: 1, kind: input, shape index: {}]   ;;  %s3850_s2 = inlined_call_operand.vmem [shape: bf16[16,256], index: 2, kind: input, shape index: {}]   ;;  %s3851_s3 = inlined_call_operand.vmem [shape: bf16[16,256], index: 3, kind: input, shape index: {}]   ;;  %s3852_s4 = inlined_call_operand.vmem [shape: bf16[16,256], index: 4, kind: input, shape index: {}]   ;;  %s3853_s5 = inlined_call_operand.hbm [shape: bf16[5,256,256], index: 5, kind: input, shape index: {}]   ;;  %s3854_s6 = inlined_call_operand.hbm [shape: bf16[256,512], index: 6, kind: input, shape index: {}]   ;;  %s3855_s7 = inlined_call_operand.vmem [shape: f32[8,256], index: 7, kind: input, shape index: {}]   ;;  %s3856_s8 = inlined_call_operand.hbm [shape: f32[16,256], index: 8, kind: output, shape index: {0}]   ;;  %s3857_s9 = inlined_call_operand.hbm [shape: f32[16,256], index: 9, kind: output, shape index: {1}]  }
   0x1   :  { %16 = vsyncpa [#allocation6], 0 }
   0x2   :  { %17 = vsyncpa [#allocation4], 0 }
   0x3   :  { %18 = vsyncpa [#allocation9], 0  ;;  %s33_s11 = sshll.u32 %s3853_s5, 4  ;;  %s3621_s12 = smov [#allocation2]   ;;  %s34_s11 = int_to_ptr.hbm [resolvable:$true] %s33_s11 }
   0x4   :  { %s35_s13 = sshll.u32 %s3621_s12, 4  ;;  %s46_s16 = sshll.u32 %s3854_s6, 4  ;;  %s36_s13 = int_to_ptr.vmem [resolvable:$true] %s35_s13  ;;  %s47_s16 = int_to_ptr.hbm [resolvable:$true] %s46_s16 }
   0x5   :  { %s3622_s17 = smov 128   ;;  %s3623_s18 = smov 8  }
   0x6   :  { %41 = dma.hbm_to_vmem [thread:$0]  %s34_s11, 20480, %s36_s13, [#allocation3], %s3622_s17, %s3622_s17, %s3623_s18  }
   0x7   :  { %s3624_s19 = smov [#allocation5]   ;;  %s3625_s21 = smov 256  }
   0x8   :  { %s48_s20 = sshll.u32 %s3624_s19, 4  ;;  %s3626_s22 = smov 16   ;;  %s49_s20 = int_to_ptr.vmem [resolvable:$true] %s48_s20 }
   0x9   :  { %54 = dma.hbm_to_vmem [thread:$0]  %s47_s16, 8192, %s49_s20, [#allocation6], %s3625_s21, %s3625_s21, %s3626_s22  }
   0xa   :  { %3613 = dma.done.wait [#allocation3], 20480  }
   0xb   :  { %3614 = vsyncadd [#allocation3], 4294946816 }
   0xc   :  { %3615 = dma.done.wait [#allocation6], 8192  }
   0xd   :  { %3616 = vsyncadd [#allocation6], 4294959104  ;;  %v2380_v0 = vld [vmem:[#allocation2 + $0x70] sm:$0xf]  ;;  %v3275_v1 = vld [vmem:[#allocation2 + $0x74] sm:$0xf0] }
   0xe   :  { %v2444_v2 = vld [vmem:[#allocation2 + $0xf0] sm:$0xf]  ;;  %v2381_v3 = vor.u32 %v3275_v1, %v2380_v0  ;;  %v3291_v4 = vld [vmem:[#allocation2 + $0xf4] sm:$0xf0]  ;;  %v3274_v5 = vld [vmem:[#allocation2 + $0x74] sm:$0xf] }
   0xf   :  { %v2382_v6 = vld [vmem:[#allocation2 + $0x78] sm:$0xf0]  ;;  %v2445_v7 = vor.u32 %v3291_v4, %v2444_v2  ;;  %v3290_v9 = vld [vmem:[#allocation2 + $0xf4] sm:$0xf]  ;;  %v2372_v11 = vld [vmem:[#allocation2 + $0x60] sm:$0xf] }
  0x10   :  { %v2385_v8 = vor.u32 %v3274_v5, %v2382_v6  ;;  %v2446_v10 = vld [vmem:[#allocation2 + $0xf8] sm:$0xf0]  ;;  %273 = vmatpush.bf16.msra.mxu0 %v2381_v3  ;;  %v3273_v13 = vld [vmem:[#allocation2 + $0x64] sm:$0xf0]  ;;  %v2436_v14 = vld [vmem:[#allocation2 + $0xe0] sm:$0xf] }
  0x11   :  { %v2449_v12 = vor.u32 %v3290_v9, %v2446_v10  ;;  %v3289_v15 = vld [vmem:[#allocation2 + $0xe4] sm:$0xf0]  ;;  %287 = vmatpush.bf16.msra.mxu1 %v2445_v7  ;;  %v2373_v16 = vor.u32 %v3273_v13, %v2372_v11  ;;  %v3272_v18 = vld [vmem:[#allocation2 + $0x64] sm:$0xf]  ;;  %v2374_v19 = vld [vmem:[#allocation2 + $0x68] sm:$0xf0] }
  0x12   :  { %301 = vmatpush.bf16.msra.mxu2 %v2385_v8  ;;  %v2437_v17 = vor.u32 %v3289_v15, %v2436_v14  ;;  %v3288_v20 = vld [vmem:[#allocation2 + $0xe4] sm:$0xf]  ;;  %v2377_v21 = vor.u32 %v3272_v18, %v2374_v19  ;;  %v2438_v22 = vld [vmem:[#allocation2 + $0xe8] sm:$0xf0]  ;;  %v2364_v23 = vld [vmem:[#allocation2 + $0x50] sm:$0xf] }
  0x13   :  { %315 = vmatpush.bf16.msra.mxu3 %v2449_v12  ;;  %v3271_v24 = vld [vmem:[#allocation2 + $0x54] sm:$0xf0]  ;;  %v2441_v25 = vor.u32 %v3288_v20, %v2438_v22  ;;  %v2428_v26 = vld [vmem:[#allocation2 + $0xd0] sm:$0xf]  ;;  %v3270_v28 = vld [vmem:[#allocation2 + $0x54] sm:$0xf] }
  0x14   :  { %v3287_v27 = vld [vmem:[#allocation2 + $0xd4] sm:$0xf0]  ;;  %274 = vmatpush.bf16.msra.mxu0 %v2373_v16  ;;  %v2365_v29 = vor.u32 %v3271_v24, %v2364_v23  ;;  %v2366_v30 = vld [vmem:[#allocation2 + $0x58] sm:$0xf0]  ;;  %v3286_v31 = vld [vmem:[#allocation2 + $0xd4] sm:$0xf] }
  0x15   :  { %v2430_v32 = vld [vmem:[#allocation2 + $0xd8] sm:$0xf0]  ;;  %288 = vmatpush.bf16.msra.mxu1 %v2437_v17  ;;  %v2429_v33 = vor.u32 %v3287_v27, %v2428_v26  ;;  %v2369_v34 = vor.u32 %v3270_v28, %v2366_v30  ;;  %v2356_v35 = vld [vmem:[#allocation2 + $0x40] sm:$0xf]  ;;  %v3269_v36 = vld [vmem:[#allocation2 + $0x44] sm:$0xf0] }
  0x16   :  { %302 = vmatpush.bf16.msra.mxu2 %v2377_v21  ;;  %v2420_v37 = vld [vmem:[#allocation2 + $0xc0] sm:$0xf]  ;;  %v2433_v38 = vor.u32 %v3286_v31, %v2430_v32  ;;  %v3285_v39 = vld [vmem:[#allocation2 + $0xc4] sm:$0xf0]  ;;  %v3268_v40 = vld [vmem:[#allocation2 + $0x44] sm:$0xf]  ;;  %v2357_v44 = vor.u32 %v3269_v36, %v2356_v35 }
  0x17   :  { %316 = vmatpush.bf16.msra.mxu3 %v2441_v25  ;;  %v2358_v41 = vld [vmem:[#allocation2 + $0x48] sm:$0xf0]  ;;  %v3284_v42 = vld [vmem:[#allocation2 + $0xc4] sm:$0xf]  ;;  %v2421_v45 = vor.u32 %v3285_v39, %v2420_v37  ;;  %v2348_v47 = vld [vmem:[#allocation2 + $0x30] sm:$0xf] }
  0x18   :  { %v2422_v43 = vld [vmem:[#allocation2 + $0xc8] sm:$0xf0]  ;;  %275 = vmatpush.bf16.msra.mxu0 %v2365_v29  ;;  %v2361_v46 = vor.u32 %v3268_v40, %v2358_v41  ;;  %v3267_v48 = vld [vmem:[#allocation2 + $0x34] sm:$0xf0]  ;;  %v2412_v49 = vld [vmem:[#allocation2 + $0xb0] sm:$0xf] }
  0x19   :  { %289 = vmatpush.bf16.msra.mxu1 %v2429_v33  ;;  %v2425_v50 = vor.u32 %v3284_v42, %v2422_v43  ;;  %v3283_v51 = vld [vmem:[#allocation2 + $0xb4] sm:$0xf0]  ;;  %v3266_v52 = vld [vmem:[#allocation2 + $0x34] sm:$0xf]  ;;  %v2350_v53 = vld [vmem:[#allocation2 + $0x38] sm:$0xf0]  ;;  %v2349_v56 = vor.u32 %v3267_v48, %v2348_v47 }
  0x1a   :  { %303 = vmatpush.bf16.msra.mxu2 %v2369_v34  ;;  %v3282_v54 = vld [vmem:[#allocation2 + $0xb4] sm:$0xf]  ;;  %v2414_v55 = vld [vmem:[#allocation2 + $0xb8] sm:$0xf0]  ;;  %v2413_v57 = vor.u32 %v3283_v51, %v2412_v49  ;;  %v2353_v58 = vor.u32 %v3266_v52, %v2350_v53  ;;  %v2340_v59 = vld [vmem:[#allocation2 + $0x20] sm:$0xf] }
  0x1b   :  { %317 = vmatpush.bf16.msra.mxu3 %v2433_v38  ;;  %v3265_v60 = vld [vmem:[#allocation2 + $0x24] sm:$0xf0]  ;;  %v2404_v61 = vld [vmem:[#allocation2 + $0xa0] sm:$0xf]  ;;  %v2417_v62 = vor.u32 %v3282_v54, %v2414_v55  ;;  %v3264_v0 = vld [vmem:[#allocation2 + $0x24] sm:$0xf] }
  0x1c   :  { %276 = vmatpush.bf16.msra.mxu0 %v2357_v44  ;;  %v3281_v63 = vld [vmem:[#allocation2 + $0xa4] sm:$0xf0]  ;;  %v2342_v1 = vld [vmem:[#allocation2 + $0x28] sm:$0xf0]  ;;  %v3280_v2 = vld [vmem:[#allocation2 + $0xa4] sm:$0xf]  ;;  %v2341_v4 = vor.u32 %v3265_v60, %v2340_v59 }
  0x1d   :  { %290 = vmatpush.bf16.msra.mxu1 %v2421_v45  ;;  %v2406_v3 = vld [vmem:[#allocation2 + $0xa8] sm:$0xf0]  ;;  %v2405_v5 = vor.u32 %v3281_v63, %v2404_v61  ;;  %v2345_v6 = vor.u32 %v3264_v0, %v2342_v1  ;;  %v2332_v7 = vld [vmem:[#allocation2 + $0x10] sm:$0xf]  ;;  %v3263_v8 = vld [vmem:[#allocation2 + $0x14] sm:$0xf0] }
  0x1e   :  { %304 = vmatpush.bf16.msra.mxu2 %v2361_v46  ;;  %v2396_v9 = vld [vmem:[#allocation2 + $0x90] sm:$0xf]  ;;  %v2409_v10 = vor.u32 %v3280_v2, %v2406_v3  ;;  %v3279_v11 = vld [vmem:[#allocation2 + $0x94] sm:$0xf0]  ;;  %v3262_v12 = vld [vmem:[#allocation2 + $0x14] sm:$0xf]  ;;  %v2333_v16 = vor.u32 %v3263_v8, %v2332_v7 }
  0x1f   :  { %318 = vmatpush.bf16.msra.mxu3 %v2425_v50  ;;  %v2334_v13 = vld [vmem:[#allocation2 + $0x18] sm:$0xf0]  ;;  %v3278_v14 = vld [vmem:[#allocation2 + $0x94] sm:$0xf]  ;;  %v2324_v17 = vld [vmem:[#allocation2] sm:$0xf]  ;;  %v2397_v19 = vor.u32 %v3279_v11, %v2396_v9 }
  0x20   :  { %277 = vmatpush.bf16.msra.mxu0 %v2349_v56  ;;  %v2398_v15 = vld [vmem:[#allocation2 + $0x98] sm:$0xf0]  ;;  %v3261_v18 = vld [vmem:[#allocation2 + $0x4] sm:$0xf0]  ;;  %v2337_v20 = vor.u32 %v3262_v12, %v2334_v13  ;;  %v2388_v21 = vld [vmem:[#allocation2 + $0x80] sm:$0xf] }
  0x21   :  { %291 = vmatpush.bf16.msra.mxu1 %v2413_v57  ;;  %v3277_v22 = vld [vmem:[#allocation2 + $0x84] sm:$0xf0]  ;;  %v3260_v23 = vld [vmem:[#allocation2 + $0x4] sm:$0xf]  ;;  %v2401_v24 = vor.u32 %v3278_v14, %v2398_v15  ;;  %v2326_v25 = vld [vmem:[#allocation2 + $0x8] sm:$0xf0]  ;;  %v2325_v31 = vor.u32 %v3261_v18, %v2324_v17 }
  0x22   :  { %305 = vmatpush.bf16.msra.mxu2 %v2353_v58  ;;  %v3276_v26 = vld [vmem:[#allocation2 + $0x84] sm:$0xf]  ;;  %v2390_v27 = vld [vmem:[#allocation2 + $0x88] sm:$0xf0]  ;;  %v2516_v28 = vld [vmem:[#allocation2 + $0x170] sm:$0xf]  ;;  %v2389_v35 = vor.u32 %v3277_v22, %v2388_v21  ;;  %v2329_v36 = vor.u32 %v3260_v23, %v2326_v25 }
  0x23   :  { %319 = vmatpush.bf16.msra.mxu3 %v2417_v62  ;;  %v3309_v29 = vld [vmem:[#allocation2 + $0x174] sm:$0xf0]  ;;  %v2580_v30 = vld [vmem:[#allocation2 + $0x1f0] sm:$0xf]  ;;  %v3308_v33 = vld [vmem:[#allocation2 + $0x174] sm:$0xf]  ;;  %v2393_v39 = vor.u32 %v3276_v26, %v2390_v27 }
  0x24   :  { %278 = vmatpush.bf16.msra.mxu0 %v2341_v4  ;;  %v3325_v32 = vld [vmem:[#allocation2 + $0x1f4] sm:$0xf0]  ;;  %v2518_v34 = vld [vmem:[#allocation2 + $0x178] sm:$0xf0]  ;;  %v3324_v37 = vld [vmem:[#allocation2 + $0x1f4] sm:$0xf]  ;;  %v2517_v40 = vor.u32 %v3309_v29, %v2516_v28 }
  0x25   :  { %292 = vmatpush.bf16.msra.mxu1 %v2405_v5  ;;  %v2582_v38 = vld [vmem:[#allocation2 + $0x1f8] sm:$0xf0]  ;;  %v2581_v41 = vor.u32 %v3325_v32, %v2580_v30  ;;  %v2521_v42 = vor.u32 %v3308_v33, %v2518_v34  ;;  %v2508_v43 = vld [vmem:[#allocation2 + $0x160] sm:$0xf]  ;;  %v3307_v44 = vld [vmem:[#allocation2 + $0x164] sm:$0xf0] }
  0x26   :  { %306 = vmatpush.bf16.msra.mxu2 %v2345_v6  ;;  %v2572_v45 = vld [vmem:[#allocation2 + $0x1e0] sm:$0xf]  ;;  %v2585_v46 = vor.u32 %v3324_v37, %v2582_v38  ;;  %v3323_v47 = vld [vmem:[#allocation2 + $0x1e4] sm:$0xf0]  ;;  %v3306_v48 = vld [vmem:[#allocation2 + $0x164] sm:$0xf]  ;;  %v2509_v52 = vor.u32 %v3307_v44, %v2508_v43 }
  0x27   :  { %320 = vmatpush.bf16.msra.mxu3 %v2409_v10  ;;  %v2510_v49 = vld [vmem:[#allocation2 + $0x168] sm:$0xf0]  ;;  %v3322_v50 = vld [vmem:[#allocation2 + $0x1e4] sm:$0xf]  ;;  %v2573_v53 = vor.u32 %v3323_v47, %v2572_v45  ;;  %v2500_v55 = vld [vmem:[#allocation2 + $0x150] sm:$0xf] }
  0x28   :  { %279 = vmatpush.bf16.msra.mxu0 %v2333_v16  ;;  %v2574_v51 = vld [vmem:[#allocation2 + $0x1e8] sm:$0xf0]  ;;  %v2513_v54 = vor.u32 %v3306_v48, %v2510_v49  ;;  %v3305_v56 = vld [vmem:[#allocation2 + $0x154] sm:$0xf0]  ;;  %v2564_v57 = vld [vmem:[#allocation2 + $0x1d0] sm:$0xf] }
  0x29   :  { %293 = vmatpush.bf16.msra.mxu1 %v2397_v19  ;;  %v2577_v58 = vor.u32 %v3322_v50, %v2574_v51  ;;  %v3321_v59 = vld [vmem:[#allocation2 + $0x1d4] sm:$0xf0]  ;;  %v3304_v60 = vld [vmem:[#allocation2 + $0x154] sm:$0xf]  ;;  %v2502_v61 = vld [vmem:[#allocation2 + $0x158] sm:$0xf0]  ;;  %v2501_v1 = vor.u32 %v3305_v56, %v2500_v55 }
  0x2a   :  { %307 = vmatpush.bf16.msra.mxu2 %v2337_v20  ;;  %v3320_v62 = vld [vmem:[#allocation2 + $0x1d4] sm:$0xf]  ;;  %v2566_v63 = vld [vmem:[#allocation2 + $0x1d8] sm:$0xf0]  ;;  %v2492_v0 = vld [vmem:[#allocation2 + $0x140] sm:$0xf]  ;;  %v2565_v5 = vor.u32 %v3321_v59, %v2564_v57  ;;  %v2505_v6 = vor.u32 %v3304_v60, %v2502_v61 }
  0x2b   :  { %321 = vmatpush.bf16.msra.mxu3 %v2401_v24  ;;  %v3303_v2 = vld [vmem:[#allocation2 + $0x144] sm:$0xf0]  ;;  %v2316_v3 = vld [vmem:[%s3848_s0] sm:$0xf]  ;;  %v3258_v9 = vld [vmem:[%s3848_s0 + $0x4] sm:$0xf]  ;;  %v2569_v11 = vor.u32 %v3320_v62, %v2566_v63 }
  0x2c   :  { %280 = vmatpush.bf16.msra.mxu0 %v2325_v31  ;;  %v3259_v4 = vld [vmem:[%s3848_s0 + $0x4] sm:$0xf0]  ;;  %v2556_v7 = vld [vmem:[#allocation2 + $0x1c0] sm:$0xf]  ;;  %v2318_v10 = vld [vmem:[%s3848_s0 + $0x8] sm:$0xf0]  ;;  %v2493_v18 = vor.u32 %v3303_v2, %v2492_v0 }
  0x2d   :  { %294 = vmatpush.bf16.msra.mxu1 %v2389_v35  ;;  %v2317_v8 = vor.u32 %v3259_v4, %v2316_v3  ;;  %v3319_v12 = vld [vmem:[#allocation2 + $0x1c4] sm:$0xf0]  ;;  %v3302_v13 = vld [vmem:[#allocation2 + $0x144] sm:$0xf]  ;;  %v2494_v14 = vld [vmem:[#allocation2 + $0x148] sm:$0xf0]  ;;  %v2321_v15 = vor.u32 %v3258_v9, %v2318_v10 }
  0x2e   :  { %308 = vmatpush.bf16.msra.mxu2 %v2329_v36  ;;  %v3318_v16 = vld [vmem:[#allocation2 + $0x1c4] sm:$0xf]  ;;  %v2558_v17 = vld [vmem:[#allocation2 + $0x1c8] sm:$0xf0]  ;;  %v2557_v19 = vor.u32 %v3319_v12, %v2556_v7  ;;  %v2497_v20 = vor.u32 %v3302_v13, %v2494_v14  ;;  %v2484_v21 = vld [vmem:[#allocation2 + $0x130] sm:$0xf] }
  0x2f   :  { %322 = vmatpush.bf16.msra.mxu3 %v2393_v39  ;;  %281 = vmatmul.bf16.vlgmr.msra.gmra.mxu0 %v2317_v8  ;;  %v3301_v22 = vld [vmem:[#allocation2 + $0x134] sm:$0xf0]  ;;  %v2548_v23 = vld [vmem:[#allocation2 + $0x1b0] sm:$0xf]  ;;  %v2561_v24 = vor.u32 %v3318_v16, %v2558_v17  ;;  %v3300_v26 = vld [vmem:[#allocation2 + $0x134] sm:$0xf] }
  0x30   :  { %536 = vmatpush.bf16.msrb.mxu0 %v2517_v40  ;;  %v3317_v25 = vld [vmem:[#allocation2 + $0x1b4] sm:$0xf0]  ;;  %v2486_v27 = vld [vmem:[#allocation2 + $0x138] sm:$0xf0]  ;;  %295 = vmatmul.bf16.vlgmr.msra.gmra.mxu1 %v2321_v15  ;;  %v3316_v28 = vld [vmem:[#allocation2 + $0x1b4] sm:$0xf]  ;;  %v2485_v30 = vor.u32 %v3301_v22, %v2484_v21 }
  0x31   :  { %550 = vmatpush.bf16.msrb.mxu1 %v2581_v41  ;;  %309 = vmatmul.bf16.vlgmr.msra.gmra.mxu2 %v2317_v8  ;;  %v2550_v29 = vld [vmem:[#allocation2 + $0x1b8] sm:$0xf0]  ;;  %v2549_v31 = vor.u32 %v3317_v25, %v2548_v23  ;;  %v2489_v32 = vor.u32 %v3300_v26, %v2486_v27  ;;  %v2476_v33 = vld [vmem:[#allocation2 + $0x120] sm:$0xf]  ;;  %v3299_v34 = vld [vmem:[#allocation2 + $0x124] sm:$0xf0] }
  0x32   :  { %564 = vmatpush.bf16.msrb.mxu2 %v2521_v42  ;;  %323 = vmatmul.bf16.vlgmr.msra.gmra.mxu3 %v2321_v15  ;;  %v2540_v35 = vld [vmem:[#allocation2 + $0x1a0] sm:$0xf]  ;;  %v2553_v36 = vor.u32 %v3316_v28, %v2550_v29  ;;  %v3315_v37 = vld [vmem:[#allocation2 + $0x1a4] sm:$0xf0]  ;;  %v3298_v38 = vld [vmem:[#allocation2 + $0x124] sm:$0xf]  ;;  %v2477_v42 = vor.u32 %v3299_v34, %v2476_v33 }
  0x33   :  { %578 = vmatpush.bf16.msrb.mxu3 %v2585_v46  ;;  %v2478_v39 = vld [vmem:[#allocation2 + $0x128] sm:$0xf0]  ;;  %v3314_v40 = vld [vmem:[#allocation2 + $0x1a4] sm:$0xf]  ;;  %v2541_v43 = vor.u32 %v3315_v37, %v2540_v35  ;;  %v2468_v45 = vld [vmem:[#allocation2 + $0x110] sm:$0xf] }
  0x34   :  { %537 = vmatpush.bf16.msrb.mxu0 %v2509_v52  ;;  %v2542_v41 = vld [vmem:[#allocation2 + $0x1a8] sm:$0xf0]  ;;  %v2481_v44 = vor.u32 %v3298_v38, %v2478_v39  ;;  %v3297_v46 = vld [vmem:[#allocation2 + $0x114] sm:$0xf0]  ;;  %v2532_v47 = vld [vmem:[#allocation2 + $0x190] sm:$0xf] }
  0x35   :  { %551 = vmatpush.bf16.msrb.mxu1 %v2573_v53  ;;  %v2545_v48 = vor.u32 %v3314_v40, %v2542_v41  ;;  %v3313_v49 = vld [vmem:[#allocation2 + $0x194] sm:$0xf0]  ;;  %v3296_v50 = vld [vmem:[#allocation2 + $0x114] sm:$0xf]  ;;  %v2470_v51 = vld [vmem:[#allocation2 + $0x118] sm:$0xf0] }
  0x36   :  { %565 = vmatpush.bf16.msrb.mxu2 %v2513_v54  ;;  %v3312_v52 = vld [vmem:[#allocation2 + $0x194] sm:$0xf]  ;;  %v2534_v53 = vld [vmem:[#allocation2 + $0x198] sm:$0xf0]  ;;  %v2469_v54 = vor.u32 %v3297_v46, %v2468_v45  ;;  %v2460_v55 = vld [vmem:[#allocation2 + $0x100] sm:$0xf]  ;;  %v2473_v59 = vor.u32 %v3296_v50, %v2470_v51 }
  0x37   :  { %579 = vmatpush.bf16.msrb.mxu3 %v2577_v58  ;;  %v3295_v56 = vld [vmem:[#allocation2 + $0x104] sm:$0xf0]  ;;  %v2524_v57 = vld [vmem:[#allocation2 + $0x180] sm:$0xf]  ;;  %v2533_v58 = vor.u32 %v3313_v49, %v2532_v47  ;;  %v3294_v61 = vld [vmem:[#allocation2 + $0x104] sm:$0xf]  ;;  %v2537_v63 = vor.u32 %v3312_v52, %v2534_v53 }
  0x38   :  { %538 = vmatpush.bf16.msrb.mxu0 %v2501_v1  ;;  %v3311_v60 = vld [vmem:[#allocation2 + $0x184] sm:$0xf0]  ;;  %v2462_v62 = vld [vmem:[#allocation2 + $0x108] sm:$0xf0]  ;;  %v3310_v0 = vld [vmem:[#allocation2 + $0x184] sm:$0xf] }
  0x39   :  { %552 = vmatpush.bf16.msrb.mxu1 %v2565_v5  ;;  %v2526_v1 = vld [vmem:[#allocation2 + $0x188] sm:$0xf0]  ;;  %v2652_v2 = vld [vmem:[#allocation2 + $0x270] sm:$0xf]  ;;  %v3343_v3 = vld [vmem:[#allocation2 + $0x274] sm:$0xf0]  ;;  %v2525_v10 = vor.u32 %v3311_v60, %v2524_v57 }
  0x3a   :  { %566 = vmatpush.bf16.msrb.mxu2 %v2505_v6  ;;  %v2716_v4 = vld [vmem:[#allocation2 + $0x2f0] sm:$0xf]  ;;  %v3359_v5 = vld [vmem:[#allocation2 + $0x2f4] sm:$0xf0]  ;;  %v2461_v6 = vor.u32 %v3295_v56, %v2460_v55  ;;  %v3342_v7 = vld [vmem:[#allocation2 + $0x274] sm:$0xf]  ;;  %v2529_v15 = vor.u32 %v3310_v0, %v2526_v1  ;;  %v2653_v16 = vor.u32 %v3343_v3, %v2652_v2 }
  0x3b   :  { %580 = vmatpush.bf16.msrb.mxu3 %v2569_v11  ;;  %v2654_v8 = vld [vmem:[#allocation2 + $0x278] sm:$0xf0]  ;;  %v3358_v9 = vld [vmem:[#allocation2 + $0x2f4] sm:$0xf]  ;;  %v2465_v11 = vor.u32 %v3294_v61, %v2462_v62  ;;  %v2452_v13 = vld [vmem:[%s3849_s1] sm:$0xf] }
  0x3c   :  { %539 = vmatpush.bf16.msrb.mxu0 %v2493_v18  ;;  %v2718_v12 = vld [vmem:[#allocation2 + $0x2f8] sm:$0xf0]  ;;  %v3293_v14 = vld [vmem:[%s3849_s1 + $0x4] sm:$0xf0]  ;;  %v2644_v17 = vld [vmem:[#allocation2 + $0x260] sm:$0xf] }
  0x3d   :  { %553 = vmatpush.bf16.msrb.mxu1 %v2557_v19  ;;  %v3341_v18 = vld [vmem:[#allocation2 + $0x264] sm:$0xf0]  ;;  %v2717_v19 = vor.u32 %v3359_v5, %v2716_v4  ;;  %v2708_v21 = vld [vmem:[#allocation2 + $0x2e0] sm:$0xf]  ;;  %v3292_v23 = vld [vmem:[%s3849_s1 + $0x4] sm:$0xf]  ;;  %v2453_v27 = vor.u32 %v3293_v14, %v2452_v13 }
  0x3e   :  { %567 = vmatpush.bf16.msrb.mxu2 %v2497_v20  ;;  %v2657_v20 = vor.u32 %v3342_v7, %v2654_v8  ;;  %v3357_v22 = vld [vmem:[#allocation2 + $0x2e4] sm:$0xf0]  ;;  %v3340_v25 = vld [vmem:[#allocation2 + $0x264] sm:$0xf]  ;;  %v2646_v26 = vld [vmem:[#allocation2 + $0x268] sm:$0xf0] }
  0x3f   :  { %581 = vmatpush.bf16.msrb.mxu3 %v2561_v24  ;;  %v2721_v24 = vor.u32 %v3358_v9, %v2718_v12  ;;  %v2454_v28 = vld [vmem:[%s3849_s1 + $0x8] sm:$0xf0]  ;;  %v3356_v29 = vld [vmem:[#allocation2 + $0x2e4] sm:$0xf]  ;;  %v2709_v33 = vor.u32 %v3357_v22, %v2708_v21  ;;  %v2649_v34 = vor.u32 %v3340_v25, %v2646_v26  ;;  %v2636_v35 = vld [vmem:[#allocation2 + $0x250] sm:$0xf] }
  0x40   :  { %540 = vmatpush.bf16.msrb.mxu0 %v2485_v30  ;;  %v2710_v30 = vld [vmem:[#allocation2 + $0x2e8] sm:$0xf0]  ;;  %v2700_v37 = vld [vmem:[#allocation2 + $0x2d0] sm:$0xf]  ;;  %v3355_v39 = vld [vmem:[#allocation2 + $0x2d4] sm:$0xf0] }
  0x41   :  { %554 = vmatpush.bf16.msrb.mxu1 %v2549_v31  ;;  %v2457_v31 = vor.u32 %v3292_v23, %v2454_v28  ;;  %v2713_v38 = vor.u32 %v3356_v29, %v2710_v30  ;;  %v3338_v40 = vld [vmem:[#allocation2 + $0x254] sm:$0xf]  ;;  %v2638_v41 = vld [vmem:[#allocation2 + $0x258] sm:$0xf0]  ;;  %v2701_v45 = vor.u32 %v3355_v39, %v2700_v37  ;;  %v2628_v47 = vld [vmem:[#allocation2 + $0x240] sm:$0xf] }
  0x42   :  { %568 = vmatpush.bf16.msrb.mxu2 %v2489_v32  ;;  %v2645_v32 = vor.u32 %v3341_v18, %v2644_v17  ;;  %v2641_v46 = vor.u32 %v3338_v40, %v2638_v41  ;;  %v2692_v49 = vld [vmem:[#allocation2 + $0x2c0] sm:$0xf]  ;;  %v3353_v51 = vld [vmem:[#allocation2 + $0x2c4] sm:$0xf0]  ;;  %v3336_v52 = vld [vmem:[#allocation2 + $0x244] sm:$0xf] }
  0x43   :  { %582 = vmatpush.bf16.msrb.mxu3 %v2553_v36  ;;  %v3339_v36 = vld [vmem:[#allocation2 + $0x254] sm:$0xf0]  ;;  %v2630_v53 = vld [vmem:[#allocation2 + $0x248] sm:$0xf0]  ;;  %v2693_v57 = vor.u32 %v3353_v51, %v2692_v49  ;;  %v2684_v61 = vld [vmem:[#allocation2 + $0x2b0] sm:$0xf] }
  0x44   :  { %541 = vmatpush.bf16.msrb.mxu0 %v2477_v42  ;;  %v3354_v42 = vld [vmem:[#allocation2 + $0x2d4] sm:$0xf]  ;;  %v2694_v55 = vld [vmem:[#allocation2 + $0x2c8] sm:$0xf0]  ;;  %v3335_v60 = vld [vmem:[#allocation2 + $0x234] sm:$0xf0] }
  0x45   :  { %555 = vmatpush.bf16.msrb.mxu1 %v2541_v43  ;;  %v2702_v43 = vld [vmem:[#allocation2 + $0x2d8] sm:$0xf0]  ;;  %v3334_v0 = vld [vmem:[#allocation2 + $0x234] sm:$0xf]  ;;  %v2612_v7 = vld [vmem:[#allocation2 + $0x220] sm:$0xf] }
  0x46   :  { %569 = vmatpush.bf16.msrb.mxu2 %v2481_v44  ;;  %v2637_v44 = vor.u32 %v3339_v36, %v2636_v35  ;;  %v2705_v50 = vor.u32 %v3354_v42, %v2702_v43  ;;  %v2622_v1 = vld [vmem:[#allocation2 + $0x238] sm:$0xf0]  ;;  %v3350_v2 = vld [vmem:[#allocation2 + $0x2b4] sm:$0xf]  ;;  %v3333_v8 = vld [vmem:[#allocation2 + $0x224] sm:$0xf0] }
  0x47   :  { %583 = vmatpush.bf16.msrb.mxu3 %v2545_v48  ;;  %v3337_v48 = vld [vmem:[#allocation2 + $0x244] sm:$0xf0]  ;;  %v2686_v3 = vld [vmem:[#allocation2 + $0x2b8] sm:$0xf0]  ;;  %v2676_v9 = vld [vmem:[#allocation2 + $0x2a0] sm:$0xf] }
  0x48   :  { %542 = vmatpush.bf16.msrb.mxu0 %v2469_v54  ;;  %v3352_v54 = vld [vmem:[#allocation2 + $0x2c4] sm:$0xf]  ;;  %v2629_v56 = vor.u32 %v3337_v48, %v2628_v47  ;;  %v2614_v13 = vld [vmem:[#allocation2 + $0x228] sm:$0xf0]  ;;  %v2668_v21 = vld [vmem:[#allocation2 + $0x290] sm:$0xf] }
  0x49   :  { %556 = vmatpush.bf16.msrb.mxu1 %v2533_v58  ;;  %v2633_v58 = vor.u32 %v3336_v52, %v2630_v53  ;;  %v2697_v62 = vor.u32 %v3352_v54, %v2694_v55  ;;  %v3332_v12 = vld [vmem:[#allocation2 + $0x224] sm:$0xf]  ;;  %v3347_v23 = vld [vmem:[#allocation2 + $0x294] sm:$0xf0]  ;;  %v2606_v25 = vld [vmem:[#allocation2 + $0x218] sm:$0xf0] }
  0x4a   :  { %570 = vmatpush.bf16.msrb.mxu2 %v2473_v59  ;;  %v2620_v59 = vld [vmem:[#allocation2 + $0x230] sm:$0xf]  ;;  %v3348_v14 = vld [vmem:[#allocation2 + $0x2a4] sm:$0xf]  ;;  %v2617_v18 = vor.u32 %v3332_v12, %v2614_v13  ;;  %v3346_v26 = vld [vmem:[#allocation2 + $0x294] sm:$0xf] }
  0x4b   :  { %584 = vmatpush.bf16.msrb.mxu3 %v2537_v63  ;;  %v3351_v63 = vld [vmem:[#allocation2 + $0x2b4] sm:$0xf0]  ;;  %v2621_v4 = vor.u32 %v3335_v60, %v2620_v59  ;;  %v2596_v29 = vld [vmem:[#allocation2 + $0x200] sm:$0xf]  ;;  %v3329_v30 = vld [vmem:[#allocation2 + $0x204] sm:$0xf0] }
  0x4c   :  { %543 = vmatpush.bf16.msrb.mxu0 %v2461_v6  ;;  %v2685_v5 = vor.u32 %v3351_v63, %v2684_v61  ;;  %v2625_v6 = vor.u32 %v3334_v0, %v2622_v1  ;;  %v3328_v35 = vld [vmem:[#allocation2 + $0x204] sm:$0xf]  ;;  %v2598_v36 = vld [vmem:[#allocation2 + $0x208] sm:$0xf0]  ;;  %v2788_v40 = vld [vmem:[#allocation2 + $0x370] sm:$0xf] }
  0x4d   :  { %557 = vmatpush.bf16.msrb.mxu1 %v2525_v10  ;;  %v2689_v10 = vor.u32 %v3350_v2, %v2686_v3  ;;  %v2662_v39 = vld [vmem:[#allocation2 + $0x288] sm:$0xf0]  ;;  %v3377_v41 = vld [vmem:[#allocation2 + $0x374] sm:$0xf0]  ;;  %v2852_v42 = vld [vmem:[#allocation2 + $0x3f0] sm:$0xf]  ;;  %v2601_v49 = vor.u32 %v3328_v35, %v2598_v36 }
  0x4e   :  { %571 = vmatpush.bf16.msrb.mxu2 %v2465_v11  ;;  %v3349_v11 = vld [vmem:[#allocation2 + $0x2a4] sm:$0xf0]  ;;  %v3393_v43 = vld [vmem:[#allocation2 + $0x3f4] sm:$0xf0]  ;;  %v3392_v47 = vld [vmem:[#allocation2 + $0x3f4] sm:$0xf]  ;;  %v2789_v54 = vor.u32 %v3377_v41, %v2788_v40 }
  0x4f   :  { %585 = vmatpush.bf16.msrb.mxu3 %v2529_v15  ;;  %544 = vmatmul.bf16.vlgmr.msrb.gmra.mxu0 %v2453_v27  ;;  %v2678_v15 = vld [vmem:[#allocation2 + $0x2a8] sm:$0xf0]  ;;  %v2677_v17 = vor.u32 %v3349_v11, %v2676_v9  ;;  %v2588_v51 = vld [vmem:[%s3850_s2] sm:$0xf]  ;;  %v3327_v52 = vld [vmem:[%s3850_s2 + $0x4] sm:$0xf0] }
  0x50   :  { %799 = vmatpush.bf16.msra.mxu0 %v2653_v16  ;;  %558 = vmatmul.bf16.vlgmr.msrb.gmra.mxu1 %v2457_v31  ;;  %v2613_v16 = vor.u32 %v3333_v8, %v2612_v7  ;;  %v2681_v22 = vor.u32 %v3348_v14, %v2678_v15  ;;  %v3326_v55 = vld [vmem:[%s3850_s2 + $0x4] sm:$0xf]  ;;  %v2780_v59 = vld [vmem:[#allocation2 + $0x360] sm:$0xf]  ;;  %v3375_v60 = vld [vmem:[#allocation2 + $0x364] sm:$0xf0]  ;;  %v2589_v2 = vor.u32 %v3327_v52, %v2588_v51 }
  0x51   :  { %813 = vmatpush.bf16.msra.mxu1 %v2717_v19  ;;  %572 = vmatmul.bf16.vlgmr.msrb.gmra.mxu2 %v2453_v27  ;;  %v2604_v19 = vld [vmem:[#allocation2 + $0x210] sm:$0xf]  ;;  %v2670_v27 = vld [vmem:[#allocation2 + $0x298] sm:$0xf0]  ;;  %v2844_v61 = vld [vmem:[#allocation2 + $0x3e0] sm:$0xf] }
  0x52   :  { %827 = vmatpush.bf16.msra.mxu2 %v2657_v20  ;;  %586 = vmatmul.bf16.vlgmr.msrb.gmra.mxu3 %v2457_v31  ;;  %v3331_v20 = vld [vmem:[#allocation2 + $0x214] sm:$0xf0]  ;;  %v2660_v31 = vld [vmem:[#allocation2 + $0x280] sm:$0xf]  ;;  %v2673_v37 = vor.u32 %v3346_v26, %v2670_v27  ;;  %v3391_v63 = vld [vmem:[#allocation2 + $0x3e4] sm:$0xf0] }
  0x53   :  { %841 = vmatpush.bf16.msra.mxu3 %v2721_v24  ;;  %v3330_v24 = vld [vmem:[#allocation2 + $0x214] sm:$0xf]  ;;  %v2605_v28 = vor.u32 %v3331_v20, %v2604_v19  ;;  %v3374_v0 = vld [vmem:[#allocation2 + $0x364] sm:$0xf]  ;;  %v2782_v1 = vld [vmem:[#allocation2 + $0x368] sm:$0xf0]  ;;  %v2845_v7 = vor.u32 %v3391_v63, %v2844_v61 }
  0x54   :  { %800 = vmatpush.bf16.msra.mxu0 %v2645_v32  ;;  %v2669_v32 = vor.u32 %v3347_v23, %v2668_v21  ;;  %v3390_v3 = vld [vmem:[#allocation2 + $0x3e4] sm:$0xf]  ;;  %v2785_v8 = vor.u32 %v3374_v0, %v2782_v1  ;;  %v2772_v9 = vld [vmem:[#allocation2 + $0x350] sm:$0xf]  ;;  %v3389_v13 = vld [vmem:[#allocation2 + $0x3d4] sm:$0xf0] }
  0x55   :  { %814 = vmatpush.bf16.msra.mxu1 %v2709_v33  ;;  %v2609_v33 = vor.u32 %v3330_v24, %v2606_v25  ;;  %v2836_v11 = vld [vmem:[#allocation2 + $0x3d0] sm:$0xf]  ;;  %v3372_v14 = vld [vmem:[#allocation2 + $0x354] sm:$0xf]  ;;  %v2774_v15 = vld [vmem:[#allocation2 + $0x358] sm:$0xf0] }
  0x56   :  { %828 = vmatpush.bf16.msra.mxu2 %v2649_v34  ;;  %v3345_v34 = vld [vmem:[#allocation2 + $0x284] sm:$0xf0]  ;;  %v2837_v19 = vor.u32 %v3389_v13, %v2836_v11  ;;  %v2777_v20 = vor.u32 %v3372_v14, %v2774_v15  ;;  %v2764_v21 = vld [vmem:[#allocation2 + $0x340] sm:$0xf]  ;;  %v3370_v26 = vld [vmem:[#allocation2 + $0x344] sm:$0xf] }
  0x57   :  { %842 = vmatpush.bf16.msra.mxu3 %v2713_v38  ;;  %v3344_v38 = vld [vmem:[#allocation2 + $0x284] sm:$0xf]  ;;  %v2661_v48 = vor.u32 %v3345_v34, %v2660_v31  ;;  %v2828_v23 = vld [vmem:[#allocation2 + $0x3c0] sm:$0xf]  ;;  %v3387_v25 = vld [vmem:[#allocation2 + $0x3c4] sm:$0xf0] }
  0x58   :  { %801 = vmatpush.bf16.msra.mxu0 %v2637_v44  ;;  %v2597_v44 = vor.u32 %v3329_v30, %v2596_v29  ;;  %v2665_v53 = vor.u32 %v3344_v38, %v2662_v39  ;;  %v2766_v27 = vld [vmem:[#allocation2 + $0x348] sm:$0xf0]  ;;  %v2829_v31 = vor.u32 %v3387_v25, %v2828_v23  ;;  %v3369_v34 = vld [vmem:[#allocation2 + $0x334] sm:$0xf0]  ;;  %v2820_v35 = vld [vmem:[#allocation2 + $0x3b0] sm:$0xf] }
  0x59   :  { %815 = vmatpush.bf16.msra.mxu1 %v2701_v45  ;;  %v3376_v45 = vld [vmem:[#allocation2 + $0x374] sm:$0xf]  ;;  %v2830_v29 = vld [vmem:[#allocation2 + $0x3c8] sm:$0xf0]  ;;  %v2758_v39 = vld [vmem:[#allocation2 + $0x338] sm:$0xf0] }
  0x5a   :  { %829 = vmatpush.bf16.msra.mxu2 %v2641_v46  ;;  %v2790_v46 = vld [vmem:[#allocation2 + $0x378] sm:$0xf0]  ;;  %v3368_v38 = vld [vmem:[#allocation2 + $0x334] sm:$0xf]  ;;  %v2750_v51 = vld [vmem:[#allocation2 + $0x328] sm:$0xf0] }
  0x5b   :  { %843 = vmatpush.bf16.msra.mxu3 %v2705_v50  ;;  %v2854_v50 = vld [vmem:[#allocation2 + $0x3f8] sm:$0xf0]  ;;  %v3384_v40 = vld [vmem:[#allocation2 + $0x3b4] sm:$0xf]  ;;  %v3382_v52 = vld [vmem:[#allocation2 + $0x3a4] sm:$0xf] }
  0x5c   :  { %802 = vmatpush.bf16.msra.mxu0 %v2629_v56  ;;  %v2590_v56 = vld [vmem:[%s3850_s2 + $0x8] sm:$0xf0]  ;;  %v2822_v41 = vld [vmem:[#allocation2 + $0x3b8] sm:$0xf0]  ;;  %v3381_v61 = vld [vmem:[#allocation2 + $0x394] sm:$0xf0] }
  0x5d   :  { %816 = vmatpush.bf16.msra.mxu1 %v2693_v57  ;;  %v2853_v57 = vor.u32 %v3393_v43, %v2852_v42  ;;  %v2742_v63 = vld [vmem:[#allocation2 + $0x318] sm:$0xf0]  ;;  %v3380_v0 = vld [vmem:[#allocation2 + $0x394] sm:$0xf]  ;;  %v2734_v11 = vld [vmem:[#allocation2 + $0x308] sm:$0xf0] }
  0x5e   :  { %830 = vmatpush.bf16.msra.mxu2 %v2633_v58  ;;  %v2793_v58 = vor.u32 %v3376_v45, %v2790_v46  ;;  %v2748_v45 = vld [vmem:[#allocation2 + $0x320] sm:$0xf]  ;;  %v3367_v46 = vld [vmem:[#allocation2 + $0x324] sm:$0xf0]  ;;  %v2806_v1 = vld [vmem:[#allocation2 + $0x398] sm:$0xf0] }
  0x5f   :  { %844 = vmatpush.bf16.msra.mxu3 %v2697_v62  ;;  %v2857_v62 = vor.u32 %v3392_v47, %v2854_v50  ;;  %v2812_v47 = vld [vmem:[#allocation2 + $0x3a0] sm:$0xf]  ;;  %v3366_v50 = vld [vmem:[#allocation2 + $0x324] sm:$0xf]  ;;  %v2798_v13 = vld [vmem:[#allocation2 + $0x388] sm:$0xf0] }
  0x60   :  { %803 = vmatpush.bf16.msra.mxu0 %v2621_v4  ;;  %v2846_v4 = vld [vmem:[#allocation2 + $0x3e8] sm:$0xf0]  ;;  %v2724_v14 = vld [vmem:[%s3852_s4] sm:$0xf]  ;;  %v2924_v15 = vld [vmem:[#allocation2 + $0x470] sm:$0xf] }
  0x61   :  { %817 = vmatpush.bf16.msra.mxu1 %v2685_v5  ;;  %v2593_v5 = vor.u32 %v3326_v55, %v2590_v56  ;;  %v2849_v12 = vor.u32 %v3390_v3, %v2846_v4  ;;  %v2753_v56 = vor.u32 %v3366_v50, %v2750_v51  ;;  %v2732_v3 = vld [vmem:[#allocation2 + $0x300] sm:$0xf]  ;;  %v3363_v4 = vld [vmem:[#allocation2 + $0x304] sm:$0xf0]  ;;  %v3360_v23 = vld [vmem:[%s3852_s4 + $0x4] sm:$0xf] }
  0x62   :  { %831 = vmatpush.bf16.msra.mxu2 %v2625_v6  ;;  %v2781_v6 = vor.u32 %v3375_v60, %v2780_v59  ;;  %v2804_v59 = vld [vmem:[#allocation2 + $0x390] sm:$0xf]  ;;  %v3424_v50 = vld [vmem:[#allocation2 + $0x4e4] sm:$0xf]  ;;  %vm1931_vm0 = vcmask 64512   ;;  %s2282_s5 = sshll.u32 %s3856_s8, 4  ;;  %s2283_s5 = int_to_ptr.hbm [resolvable:$true] %s2282_s5 }
  0x63   :  { %845 = vmatpush.bf16.msra.mxu3 %v2689_v10  ;;  %v3373_v10 = vld [vmem:[#allocation2 + $0x354] sm:$0xf0]  ;;  %s3628_s2 = smov [#allocation8]   ;;  %s2295_s8 = sshll.u32 %s3857_s9, 4  ;;  %s2296_s8 = int_to_ptr.hbm [resolvable:$true] %s2295_s8 }
  0x64   :  { %804 = vmatpush.bf16.msra.mxu0 %v2613_v16  ;;  %v3388_v16 = vld [vmem:[#allocation2 + $0x3d4] sm:$0xf]  ;;  %s2293_s6 = sshll.u32 %s3628_s2, 4  ;;  %s2294_s6 = int_to_ptr.vmem [resolvable:$true] %s2293_s6 }
  0x65   :  { %818 = vmatpush.bf16.msra.mxu1 %v2677_v17  ;;  %v2838_v17 = vld [vmem:[#allocation2 + $0x3d8] sm:$0xf0] }
  0x66   :  { %832 = vmatpush.bf16.msra.mxu2 %v2617_v18  ;;  %v2773_v18 = vor.u32 %v3373_v10, %v2772_v9  ;;  %v2841_v24 = vor.u32 %v3388_v16, %v2838_v17  ;;  %v3362_v9 = vld [vmem:[#allocation2 + $0x304] sm:$0xf]  ;;  %v2809_v10 = vor.u32 %v3380_v0, %v2806_v1  ;;  %v3411_v16 = vld [vmem:[#allocation2 + $0x474] sm:$0xf0]  ;;  %v2733_v17 = vor.u32 %v3363_v4, %v2732_v3  ;;  %v2974_v0 = vld [vmem:[#allocation2 + $0x4d8] sm:$0xf0] }
  0x67   :  { %846 = vmatpush.bf16.msra.mxu3 %v2681_v22  ;;  %v3371_v22 = vld [vmem:[#allocation2 + $0x344] sm:$0xf0]  ;;  %v2892_v1 = vld [vmem:[#allocation2 + $0x430] sm:$0xf]  ;;  %v3403_v3 = vld [vmem:[#allocation2 + $0x434] sm:$0xf0] }
  0x68   :  { %805 = vmatpush.bf16.msra.mxu0 %v2605_v28  ;;  %v3386_v28 = vld [vmem:[#allocation2 + $0x3c4] sm:$0xf]  ;;  %v2765_v30 = vor.u32 %v3371_v22, %v2764_v21  ;;  %v2737_v22 = vor.u32 %v3362_v9, %v2734_v11  ;;  %v3402_v4 = vld [vmem:[#allocation2 + $0x434] sm:$0xf]  ;;  %v2964_v9 = vld [vmem:[#allocation2 + $0x4c0] sm:$0xf] }
  0x69   :  { %819 = vmatpush.bf16.msra.mxu1 %v2669_v32  ;;  %v2769_v32 = vor.u32 %v3370_v26, %v2766_v27  ;;  %v2833_v36 = vor.u32 %v3386_v28, %v2830_v29  ;;  %v2925_v26 = vor.u32 %v3411_v16, %v2924_v15  ;;  %v2916_v27 = vld [vmem:[#allocation2 + $0x460] sm:$0xf]  ;;  %v2988_v28 = vld [vmem:[#allocation2 + $0x4f0] sm:$0xf]  ;;  %v3427_v29 = vld [vmem:[#allocation2 + $0x4f4] sm:$0xf0] }
  0x6a   :  { %833 = vmatpush.bf16.msra.mxu2 %v2609_v33  ;;  %v2756_v33 = vld [vmem:[#allocation2 + $0x330] sm:$0xf]  ;;  %v3420_v11 = vld [vmem:[#allocation2 + $0x4c4] sm:$0xf]  ;;  %v2884_v16 = vld [vmem:[#allocation2 + $0x420] sm:$0xf] }
  0x6b   :  { %847 = vmatpush.bf16.msra.mxu3 %v2673_v37  ;;  %v3385_v37 = vld [vmem:[#allocation2 + $0x3b4] sm:$0xf0]  ;;  %v2757_v42 = vor.u32 %v3369_v34, %v2756_v33  ;;  %v3426_v33 = vld [vmem:[#allocation2 + $0x4f4] sm:$0xf]  ;;  %v2990_v34 = vld [vmem:[#allocation2 + $0x4f8] sm:$0xf0] }
  0x6c   :  { %806 = vmatpush.bf16.msra.mxu0 %v2597_v44  ;;  %v2821_v43 = vor.u32 %v3385_v37, %v2820_v35  ;;  %v2761_v44 = vor.u32 %v3368_v38, %v2758_v39  ;;  %v2918_v37 = vld [vmem:[#allocation2 + $0x468] sm:$0xf0]  ;;  %v2989_v38 = vor.u32 %v3427_v29, %v2988_v28  ;;  %v3399_v29 = vld [vmem:[#allocation2 + $0x414] sm:$0xf0] }
  0x6d   :  { %820 = vmatpush.bf16.msra.mxu1 %v2661_v48  ;;  %v2825_v48 = vor.u32 %v3384_v40, %v2822_v41  ;;  %v2993_v40 = vor.u32 %v3426_v33, %v2990_v34  ;;  %v2948_v34 = vld [vmem:[#allocation2 + $0x4a0] sm:$0xf] }
  0x6e   :  { %834 = vmatpush.bf16.msra.mxu2 %v2601_v49  ;;  %v3383_v49 = vld [vmem:[#allocation2 + $0x3a4] sm:$0xf0] }
  0x6f   :  { %848 = vmatpush.bf16.msra.mxu3 %v2665_v53  ;;  %807 = vmatmul.bf16.vlgmr.msra.gmra.mxu0 %v2589_v2  ;;  %v2814_v53 = vld [vmem:[#allocation2 + $0x3a8] sm:$0xf0]  ;;  %v2813_v55 = vor.u32 %v3383_v49, %v2812_v47  ;;  %v3425_v49 = vld [vmem:[#allocation2 + $0x4e4] sm:$0xf0] }
  0x70   :  { %1062 = vmatpush.bf16.msrb.mxu0 %v2789_v54  ;;  %821 = vmatmul.bf16.vlgmr.msra.gmra.mxu1 %v2593_v5  ;;  %v2749_v54 = vor.u32 %v3367_v46, %v2748_v45  ;;  %v2817_v60 = vor.u32 %v3382_v52, %v2814_v53  ;;  %v2910_v45 = vld [vmem:[#allocation2 + $0x458] sm:$0xf0]  ;;  %v2982_v52 = vld [vmem:[#allocation2 + $0x4e8] sm:$0xf0] }
  0x71   :  { %1076 = vmatpush.bf16.msrb.mxu1 %v2853_v57  ;;  %835 = vmatmul.bf16.vlgmr.msra.gmra.mxu2 %v2589_v2  ;;  %v2740_v57 = vld [vmem:[#allocation2 + $0x310] sm:$0xf]  ;;  %v2985_v53 = vor.u32 %v3424_v50, %v2982_v52  ;;  %v3415_v52 = vld [vmem:[#allocation2 + $0x494] sm:$0xf0] }
  0x72   :  { %1090 = vmatpush.bf16.msrb.mxu2 %v2793_v58  ;;  %849 = vmatmul.bf16.vlgmr.msra.gmra.mxu3 %v2593_v5  ;;  %v3365_v58 = vld [vmem:[#allocation2 + $0x314] sm:$0xf0]  ;;  %v2805_v5 = vor.u32 %v3381_v61, %v2804_v59  ;;  %v2972_v59 = vld [vmem:[#allocation2 + $0x4d0] sm:$0xf] }
  0x73   :  { %1104 = vmatpush.bf16.msrb.mxu3 %v2857_v62  ;;  %v3364_v62 = vld [vmem:[#allocation2 + $0x314] sm:$0xf]  ;;  %v2741_v2 = vor.u32 %v3365_v58, %v2740_v57  ;;  %v2902_v58 = vld [vmem:[#allocation2 + $0x448] sm:$0xf0] }
  0x74   :  { %1063 = vmatpush.bf16.msrb.mxu0 %v2781_v6  ;;  %v2745_v6 = vor.u32 %v3364_v62, %v2742_v63  ;;  %v3422_v63 = vld [vmem:[#allocation2 + $0x4d4] sm:$0xf] }
  0x75   :  { %1077 = vmatpush.bf16.msrb.mxu1 %v2845_v7  ;;  %v2796_v7 = vld [vmem:[#allocation2 + $0x380] sm:$0xf] }
  0x76   :  { %1091 = vmatpush.bf16.msrb.mxu2 %v2785_v8  ;;  %v3379_v8 = vld [vmem:[#allocation2 + $0x384] sm:$0xf0] }
  0x77   :  { %1105 = vmatpush.bf16.msrb.mxu3 %v2849_v12  ;;  %v3378_v12 = vld [vmem:[#allocation2 + $0x384] sm:$0xf]  ;;  %v2797_v21 = vor.u32 %v3379_v8, %v2796_v7  ;;  %v2893_v7 = vor.u32 %v3403_v3, %v2892_v1  ;;  %v2934_v1 = vld [vmem:[#allocation2 + $0x488] sm:$0xf0]  ;;  %v3236_v3 = vld [vmem:[#allocation5 + $0x1e0] sm:$0xf] }
  0x78   :  { %1064 = vmatpush.bf16.msrb.mxu0 %v2773_v18  ;;  %v3361_v18 = vld [vmem:[%s3852_s4 + $0x4] sm:$0xf0]  ;;  %v2801_v25 = vor.u32 %v3378_v12, %v2798_v13 }
  0x79   :  { %1078 = vmatpush.bf16.msrb.mxu1 %v2837_v19  ;;  %v3410_v19 = vld [vmem:[#allocation2 + $0x474] sm:$0xf] }
  0x7a   :  { %1092 = vmatpush.bf16.msrb.mxu2 %v2777_v20  ;;  %v2926_v20 = vld [vmem:[#allocation2 + $0x478] sm:$0xf0] }
  0x7b   :  { %1106 = vmatpush.bf16.msrb.mxu3 %v2841_v24  ;;  %v2726_v24 = vld [vmem:[%s3852_s4 + $0x8] sm:$0xf0] }
  0x7c   :  { %1065 = vmatpush.bf16.msrb.mxu0 %v2765_v30  ;;  %v2725_v30 = vor.u32 %v3361_v18, %v2724_v14  ;;  %v2729_v35 = vor.u32 %v3360_v23, %v2726_v24  ;;  %v2966_v14 = vld [vmem:[#allocation2 + $0x4c8] sm:$0xf0]  ;;  %v3400_v18 = vld [vmem:[#allocation2 + $0x424] sm:$0xf] }
  0x7d   :  { %1079 = vmatpush.bf16.msrb.mxu1 %v2829_v31  ;;  %v2929_v31 = vor.u32 %v3410_v19, %v2926_v20  ;;  %v2969_v15 = vor.u32 %v3420_v11, %v2966_v14  ;;  %v2886_v20 = vld [vmem:[#allocation2 + $0x428] sm:$0xf0]  ;;  %v3450_v11 = vld [vmem:[#allocation5 + $0xac] sm:$0xf0] }
  0x7e   :  { %1093 = vmatpush.bf16.msrb.mxu2 %v2769_v32  ;;  %v3409_v32 = vld [vmem:[#allocation2 + $0x464] sm:$0xf0]  ;;  %v2889_v23 = vor.u32 %v3400_v18, %v2886_v20  ;;  %v3220_v20 = vld [vmem:[#allocation5 + $0x1c0] sm:$0xf] }
  0x7f   :  { %1107 = vmatpush.bf16.msrb.mxu3 %v2833_v36  ;;  %v3408_v36 = vld [vmem:[#allocation2 + $0x464] sm:$0xf]  ;;  %v2917_v39 = vor.u32 %v3409_v32, %v2916_v27  ;;  %v2876_v27 = vld [vmem:[#allocation2 + $0x410] sm:$0xf]  ;;  %v3745_v18 = vld [vmem:[%s3855_s7 + $0x8] sm:$0xff] }
  0x80   :  { %1066 = vmatpush.bf16.msrb.mxu0 %v2757_v42  ;;  %v2921_v41 = vor.u32 %v3408_v36, %v2918_v37  ;;  %v2908_v42 = vld [vmem:[#allocation2 + $0x450] sm:$0xf]  ;;  %v2877_v32 = vor.u32 %v3399_v29, %v2876_v27  ;;  %v3416_v36 = vld [vmem:[#allocation2 + $0x4a4] sm:$0xf]  ;;  %v3060_v27 = vld [vmem:[#allocation5 + $0x80] sm:$0xf] }
  0x81   :  { %1080 = vmatpush.bf16.msrb.mxu1 %v2821_v43  ;;  %v3407_v43 = vld [vmem:[#allocation2 + $0x454] sm:$0xf0]  ;;  %v102_v29 = vperm.slane %v3745_v18, 0 }
  0x82   :  { %1094 = vmatpush.bf16.msrb.mxu2 %v2761_v44  ;;  %v3406_v44 = vld [vmem:[#allocation2 + $0x454] sm:$0xf]  ;;  %v2909_v46 = vor.u32 %v3407_v43, %v2908_v42  ;;  %v3396_v42 = vld [vmem:[#allocation2 + $0x404] sm:$0xf]  ;;  %v2870_v43 = vld [vmem:[#allocation2 + $0x408] sm:$0xf0] }
  0x83   :  { %1108 = vmatpush.bf16.msrb.mxu3 %v2825_v48  ;;  %v2913_v47 = vor.u32 %v3406_v44, %v2910_v45  ;;  %v2980_v48 = vld [vmem:[#allocation2 + $0x4e0] sm:$0xf] }
  0x84   :  { %1067 = vmatpush.bf16.msrb.mxu0 %v2749_v54  ;;  %v2981_v51 = vor.u32 %v3425_v49, %v2980_v48  ;;  %v2900_v54 = vld [vmem:[#allocation2 + $0x440] sm:$0xf]  ;;  %v3110_v48 = vld [vmem:[#allocation5 + $0xf0] sm:$0xf0]  ;;  %v2873_v49 = vor.u32 %v3396_v42, %v2870_v43 }
  0x85   :  { %1081 = vmatpush.bf16.msrb.mxu1 %v2813_v55  ;;  %v3405_v55 = vld [vmem:[#allocation2 + $0x444] sm:$0xf0]  ;;  %v3108_v44 = vld [vmem:[#allocation5 + $0xe0] sm:$0xf] }
  0x86   :  { %1095 = vmatpush.bf16.msrb.mxu2 %v2753_v56  ;;  %v3404_v56 = vld [vmem:[#allocation2 + $0x444] sm:$0xf]  ;;  %v2901_v57 = vor.u32 %v3405_v55, %v2900_v54  ;;  %v3044_v43 = vld [vmem:[#allocation5 + $0x60] sm:$0xf] }
  0x87   :  { %1109 = vmatpush.bf16.msrb.mxu3 %v2817_v60  ;;  %v3423_v60 = vld [vmem:[#allocation2 + $0x4d4] sm:$0xf0]  ;;  %v2905_v61 = vor.u32 %v3404_v56, %v2902_v58  ;;  %v2942_v56 = vld [vmem:[#allocation2 + $0x498] sm:$0xf0]  ;;  %v3454_v58 = vld [vmem:[#allocation5 + $0xcc] sm:$0xf0] }
  0x88   :  { %1068 = vmatpush.bf16.msrb.mxu0 %v2741_v2  ;;  %v2973_v62 = vor.u32 %v3423_v60, %v2972_v59  ;;  %v2977_v2 = vor.u32 %v3422_v63, %v2974_v0  ;;  %v3452_v60 = vld [vmem:[#allocation5 + $0xc4] sm:$0xf]  ;;  %v3413_v63 = vld [vmem:[#allocation2 + $0x484] sm:$0xf0] }
  0x89   :  { %1082 = vmatpush.bf16.msrb.mxu1 %v2805_v5  ;;  %v2894_v5 = vld [vmem:[#allocation2 + $0x438] sm:$0xf0]  ;;  %v3412_v0 = vld [vmem:[#allocation2 + $0x484] sm:$0xf] }
  0x8a   :  { %1096 = vmatpush.bf16.msrb.mxu2 %v2745_v6  ;;  %v3739_v6 = vld [vmem:[%s3855_s7] sm:$0xff]  ;;  %v2897_v8 = vor.u32 %v3402_v4, %v2894_v5  ;;  %v3490_v4 = vld [vmem:[#allocation5 + $0x1ec] sm:$0xf0] }
  0x8b   :  { %1110 = vmatpush.bf16.msrb.mxu3 %v2809_v10  ;;  %v3421_v10 = vld [vmem:[#allocation2 + $0x4c4] sm:$0xf0]  ;;  %v101_v12 = vperm.slane %v3739_v6, 0  ;;  %v3488_v5 = vld [vmem:[#allocation5 + $0x1e4] sm:$0xf]  ;;  %v3237_v14 = vor.u32 %v3490_v4, %v3236_v3 }
  0x8c   :  { %1069 = vmatpush.bf16.msrb.mxu0 %v2733_v17  ;;  %v2965_v13 = vor.u32 %v3421_v10, %v2964_v9  ;;  %v3401_v17 = vld [vmem:[#allocation2 + $0x424] sm:$0xf0]  ;;  %v3238_v9 = vld [vmem:[#allocation5 + $0x1f0] sm:$0xf0]  ;;  %v3076_v10 = vld [vmem:[#allocation5 + $0xa0] sm:$0xf] }
  0x8d   :  { %1083 = vmatpush.bf16.msrb.mxu1 %v2797_v21  ;;  %v2885_v19 = vor.u32 %v3401_v17, %v2884_v16  ;;  %v2956_v21 = vld [vmem:[#allocation2 + $0x4b0] sm:$0xf]  ;;  %v3078_v16 = vld [vmem:[#allocation5 + $0xb0] sm:$0xf0]  ;;  %v3172_v4 = vld [vmem:[#allocation5 + $0x160] sm:$0xf] }
  0x8e   :  { %1097 = vmatpush.bf16.msrb.mxu2 %v2737_v22  ;;  %v3419_v22 = vld [vmem:[#allocation2 + $0x4b4] sm:$0xf0] }
  0x8f   :  { %1111 = vmatpush.bf16.msrb.mxu3 %v2801_v25  ;;  %1070 = vmatmul.bf16.vlgmr.msrb.gmra.mxu0 %v2725_v30  ;;  %v2957_v24 = vor.u32 %v3419_v22, %v2956_v21  ;;  %v3418_v25 = vld [vmem:[#allocation2 + $0x4b4] sm:$0xf]  ;;  %v3486_v21 = vld [vmem:[#allocation5 + $0x1cc] sm:$0xf0] }
  0x90   :  { %1325 = vmatpush.bf16.msra.mxu0 %v2925_v26  ;;  %1084 = vmatmul.bf16.vlgmr.msrb.gmra.mxu1 %v2729_v35  ;;  %v2958_v26 = vld [vmem:[#allocation2 + $0x4b8] sm:$0xf0] }
  0x91   :  { %1098 = vmatmul.bf16.vlgmr.msrb.gmra.mxu2 %v2725_v30  ;;  %1339 = vmatpush.bf16.msra.mxu1 %v2989_v38  ;;  %v2961_v28 = vor.u32 %v3418_v25, %v2958_v26  ;;  %v3398_v30 = vld [vmem:[#allocation2 + $0x414] sm:$0xf]  ;;  %v2950_v38 = vld [vmem:[#allocation2 + $0x4a8] sm:$0xf0] }
  0x92   :  { %1353 = vmatpush.bf16.msra.mxu2 %v2929_v31  ;;  %1112 = vmatmul.bf16.vlgmr.msrb.gmra.mxu3 %v2729_v35  ;;  %v2878_v31 = vld [vmem:[#allocation2 + $0x418] sm:$0xf0]  ;;  %v3417_v35 = vld [vmem:[#allocation2 + $0x4a4] sm:$0xf0]  ;;  %v3222_v25 = vld [vmem:[#allocation5 + $0x1d0] sm:$0xf0] }
  0x93   :  { %1367 = vmatpush.bf16.msra.mxu3 %v2993_v40  ;;  %v2881_v33 = vor.u32 %v3398_v30, %v2878_v31  ;;  %v2949_v37 = vor.u32 %v3417_v35, %v2948_v34  ;;  %v3397_v40 = vld [vmem:[#allocation2 + $0x404] sm:$0xf0]  ;;  %v3221_v31 = vor.u32 %v3486_v21, %v3220_v20 }
  0x94   :  { %1326 = vmatpush.bf16.msra.mxu0 %v2917_v39  ;;  %v2868_v39 = vld [vmem:[#allocation2 + $0x400] sm:$0xf] }
  0x95   :  { %1340 = vmatpush.bf16.msra.mxu1 %v2981_v51  ;;  %v2869_v45 = vor.u32 %v3397_v40, %v2868_v39  ;;  %v2940_v51 = vld [vmem:[#allocation2 + $0x490] sm:$0xf]  ;;  %v3480_v39 = vld [vmem:[#allocation5 + $0x1a4] sm:$0xf]  ;;  %v3206_v40 = vld [vmem:[#allocation5 + $0x1b0] sm:$0xf0] }
  0x96   :  { %1354 = vmatpush.bf16.msra.mxu2 %v2921_v41  ;;  %v2953_v41 = vor.u32 %v3416_v36, %v2950_v38  ;;  %v2941_v55 = vor.u32 %v3415_v52, %v2940_v51  ;;  %v3204_v36 = vld [vmem:[#allocation5 + $0x1a0] sm:$0xf]  ;;  %v3209_v51 = vor.u32 %v3480_v39, %v3206_v40  ;;  %v3116_v40 = vld [vmem:[#allocation5 + $0xe8] sm:$0xf] }
  0x97   :  { %1368 = vmatpush.bf16.msra.mxu3 %v2985_v53  ;;  %v3414_v53 = vld [vmem:[#allocation2 + $0x494] sm:$0xf]  ;;  %v3188_v52 = vld [vmem:[#allocation5 + $0x180] sm:$0xf] }
  0x98   :  { %1327 = vmatpush.bf16.msra.mxu0 %v2909_v46  ;;  %v3458_v46 = vld [vmem:[#allocation5 + $0xec] sm:$0xf0]  ;;  %v2945_v59 = vor.u32 %v3414_v53, %v2942_v56 }
  0x99   :  { %1341 = vmatpush.bf16.msra.mxu1 %v2973_v62  ;;  %v3109_v50 = vor.u32 %v3458_v46, %v3108_v44  ;;  %v2932_v62 = vld [vmem:[#allocation2 + $0x480] sm:$0xf]  ;;  %v3442_v44 = vld [vmem:[#allocation5 + $0x6c] sm:$0xf0] }
  0x9a   :  { %1355 = vmatpush.bf16.msra.mxu2 %v2913_v47  ;;  %v3456_v47 = vld [vmem:[#allocation5 + $0xe4] sm:$0xf]  ;;  %v3478_v53 = vld [vmem:[#allocation5 + $0x18c] sm:$0xf0]  ;;  %v3045_v56 = vor.u32 %v3442_v44, %v3044_v43  ;;  %v3118_v44 = vld [vmem:[#allocation5 + $0xf8] sm:$0xf0] }
  0x9b   :  { %1369 = vmatpush.bf16.msra.mxu3 %v2977_v2  ;;  %v3113_v54 = vor.u32 %v3456_v47, %v3110_v48  ;;  %v3440_v48 = vld [vmem:[#allocation5 + $0x64] sm:$0xf] }
  0x9c   :  { %1328 = vmatpush.bf16.msra.mxu0 %v2901_v57  ;;  %v3092_v57 = vld [vmem:[#allocation5 + $0xc0] sm:$0xf] }
  0x9d   :  { %1342 = vmatpush.bf16.msra.mxu1 %v2965_v13  ;;  %v3093_v2 = vor.u32 %v3454_v58, %v3092_v57  ;;  %v2937_v13 = vor.u32 %v3412_v0, %v2934_v1  ;;  %v3476_v57 = vld [vmem:[#allocation5 + $0x184] sm:$0xf]  ;;  %v3190_v58 = vld [vmem:[#allocation5 + $0x190] sm:$0xf0] }
  0x9e   :  { %1356 = vmatpush.bf16.msra.mxu2 %v2905_v61  ;;  %v3094_v61 = vld [vmem:[#allocation5 + $0xd0] sm:$0xf0]  ;;  %v3436_v0 = vld [vmem:[#allocation5 + $0x44] sm:$0xf]  ;;  %v3193_v3 = vor.u32 %v3476_v57, %v3190_v58  ;;  %v3102_v57 = vld [vmem:[#allocation5 + $0xd8] sm:$0xf0] }
  0x9f   :  { %1370 = vmatpush.bf16.msra.mxu3 %v2969_v15  ;;  %v3448_v15 = vld [vmem:[#allocation5 + $0xa4] sm:$0xf]  ;;  %v3030_v1 = vld [vmem:[#allocation5 + $0x50] sm:$0xf0]  ;;  %v3124_v58 = vld [vmem:[#allocation5 + $0x100] sm:$0xf] }
  0xa0   :  { %1329 = vmatpush.bf16.msra.mxu0 %v2893_v7  ;;  %v3097_v7 = vor.u32 %v3452_v60, %v3094_v61  ;;  %v3081_v26 = vor.u32 %v3448_v15, %v3078_v16  ;;  %v3028_v60 = vld [vmem:[#allocation5 + $0x40] sm:$0xf]  ;;  %v3438_v61 = vld [vmem:[#allocation5 + $0x4c] sm:$0xf0] }
  0xa1   :  { %1343 = vmatpush.bf16.msra.mxu1 %v2957_v24  ;;  %v3484_v24 = vld [vmem:[#allocation5 + $0x1c4] sm:$0xf] }
  0xa2   :  { %1357 = vmatpush.bf16.msra.mxu2 %v2897_v8  ;;  %v2933_v8 = vor.u32 %v3413_v63, %v2932_v62  ;;  %v3225_v35 = vor.u32 %v3484_v24, %v3222_v25  ;;  %v3189_v63 = vor.u32 %v3478_v53, %v3188_v52  ;;  %v3156_v24 = vld [vmem:[#allocation5 + $0x140] sm:$0xf]  ;;  %v3470_v25 = vld [vmem:[#allocation5 + $0x14c] sm:$0xf0]  ;;  %v3100_v52 = vld [vmem:[#allocation5 + $0xc8] sm:$0xf] }
  0xa3   :  { %1371 = vmatpush.bf16.msra.mxu3 %v2961_v28  ;;  %v3446_v28 = vld [vmem:[#allocation5 + $0x8c] sm:$0xf0]  ;;  %v3455_v53 = vld [vmem:[#allocation5 + $0xd4] sm:$0xf0] }
  0xa4   :  { %1330 = vmatpush.bf16.msra.mxu0 %v2885_v19  ;;  %v3241_v19 = vor.u32 %v3488_v5, %v3238_v9  ;;  %v3061_v38 = vor.u32 %v3446_v28, %v3060_v27  ;;  %v3474_v5 = vld [vmem:[#allocation5 + $0x16c] sm:$0xf0]  ;;  %v3157_v27 = vor.u32 %v3470_v25, %v3156_v24  ;;  %v3158_v28 = vld [vmem:[#allocation5 + $0x150] sm:$0xf0]  ;;  %v3230_v25 = vld [vmem:[#allocation5 + $0x1d8] sm:$0xf0] }
  0xa5   :  { %1344 = vmatpush.bf16.msra.mxu1 %v2949_v37  ;;  %v3482_v37 = vld [vmem:[#allocation5 + $0x1ac] sm:$0xf0]  ;;  %v3173_v16 = vor.u32 %v3474_v5, %v3172_v4  ;;  %v3244_v4 = vld [vmem:[#allocation5 + $0x1e8] sm:$0xf]  ;;  %v3491_v5 = vld [vmem:[#allocation5 + $0x1f4] sm:$0xf0] }
  0xa6   :  { %1358 = vmatpush.bf16.msra.mxu2 %v2889_v23  ;;  %v3077_v23 = vor.u32 %v3450_v11, %v3076_v10  ;;  %v3205_v47 = vor.u32 %v3482_v37, %v3204_v36  ;;  %v3033_v10 = vor.u32 %v3436_v0, %v3030_v1  ;;  %v3012_v11 = vld [vmem:[#allocation5 + $0x20] sm:$0xf]  ;;  %v3395_v37 = vld [vmem:[%s3851_s3 + $0x4] sm:$0xf0]  ;;  %v3394_v0 = vld [vmem:[%s3851_s3 + $0x4] sm:$0xf] }
  0xa7   :  { %1372 = vmatpush.bf16.msra.mxu3 %v2953_v41  ;;  %v2860_v36 = vld [vmem:[%s3851_s3] sm:$0xf] }
  0xa8   :  { %1331 = vmatpush.bf16.msra.mxu0 %v2877_v32  ;;  %v3444_v32 = vld [vmem:[#allocation5 + $0x84] sm:$0xf]  ;;  %v2861_v39 = vor.u32 %v3395_v37, %v2860_v36  ;;  %v3483_v36 = vld [vmem:[#allocation5 + $0x1b4] sm:$0xf0]  ;;  %v3481_v37 = vld [vmem:[#allocation5 + $0x1ac] sm:$0xf] }
  0xa9   :  { %1345 = vmatpush.bf16.msra.mxu1 %v2941_v55 }
  0xaa   :  { %1359 = vmatpush.bf16.msra.mxu2 %v2881_v33  ;;  %v3062_v33 = vld [vmem:[#allocation5 + $0x90] sm:$0xf0] }
  0xab   :  { %1373 = vmatpush.bf16.msra.mxu3 %v2945_v59  ;;  %v3065_v42 = vor.u32 %v3444_v32, %v3062_v33  ;;  %v3428_v32 = vld [vmem:[#allocation5 + $0x4] sm:$0xf] }
  0xac   :  { %1332 = vmatpush.bf16.msra.mxu0 %v2869_v45  ;;  %v282_v17 = vpop.f32.mrf.mxu0 }
  0xad   :  { %v283_v22 = vadd.f32 %v282_v17, %v101_v12  ;;  %1346 = vmatpush.bf16.msra.mxu1 %v2933_v8  ;;  %v296_v30 = vpop.f32.mrf.mxu1  ;;  %v3174_v8 = vld [vmem:[#allocation5 + $0x170] sm:$0xf0]  ;;  %v3432_v17 = vld [vmem:[#allocation5 + $0x24] sm:$0xf] }
  0xae   :  { %1360 = vmatpush.bf16.msra.mxu2 %v2873_v49  ;;  %v3046_v49 = vld [vmem:[#allocation5 + $0x70] sm:$0xf0] }
  0xaf   :  { %1374 = vmatpush.bf16.msra.mxu3 %v2937_v13  ;;  %v3750_v34 = vadd.f32 %v296_v30, %v283_v22  ;;  %v3049_v59 = vor.u32 %v3440_v48, %v3046_v49  ;;  %v3434_v13 = vld [vmem:[#allocation5 + $0x2c] sm:$0xf0]  ;;  %v2996_v30 = vld [vmem:[#allocation5] sm:$0xf]  ;;  %1333 = vmatmul.bf16.vlgmr.msra.gmra.mxu0 %v2861_v39  ;;  %v3464_v49 = vld [vmem:[#allocation5 + $0x124] sm:$0xf] }
  0xb0   :  { %1767 = vmatpush.bf16.msrb.mxu0 %v3109_v50  ;;  %v3013_v22 = vor.u32 %v3434_v13, %v3012_v11  ;;  %v3451_v13 = vld [vmem:[#allocation5 + $0xb4] sm:$0xf0] }
  0xb1   :  { %1781 = vmatpush.bf16.msrb.mxu1 %v3237_v14  ;;  %1361 = vmatmul.bf16.vlgmr.msra.gmra.mxu2 %v2861_v39  ;;  %v3214_v39 = vld [vmem:[#allocation5 + $0x1b8] sm:$0xf0] }
  0xb2   :  { %1795 = vmatpush.bf16.msrb.mxu2 %v3113_v54 }
  0xb3   :  { %1809 = vmatpush.bf16.msrb.mxu3 %v3241_v19  ;;  %v3014_v19 = vld [vmem:[#allocation5 + $0x30] sm:$0xf0] }
  0xb4   :  { %1768 = vmatpush.bf16.msrb.mxu0 %v3093_v2  ;;  %v310_v41 = vpop.f32.mrf.mxu2  ;;  %v284_v50 = vpop.f32.mrf.mxu0 }
  0xb5   :  { %v311_v45 = vadd.f32 %v310_v41, %v102_v29  ;;  %v324_v46 = vpop.f32.mrf.mxu3  ;;  %1782 = vmatpush.bf16.msrb.mxu1 %v3221_v31  ;;  %v285_v55 = vadd.f32 %v284_v50, %v101_v12  ;;  %v298_v62 = vpop.f32.mrf.mxu1  ;;  %v3029_v12 = vor.u32 %v3438_v61, %v3028_v60  ;;  %v3430_v31 = vld [vmem:[#allocation5 + $0xc] sm:$0xf0]  ;;  %v3459_v41 = vld [vmem:[#allocation5 + $0xf4] sm:$0xf0]  ;;  %v3142_v50 = vld [vmem:[#allocation5 + $0x130] sm:$0xf0] }
  0xb6   :  { %1796 = vmatpush.bf16.msrb.mxu2 %v3097_v7  ;;  %v3472_v7 = vld [vmem:[#allocation5 + $0x164] sm:$0xf]  ;;  %v2997_v33 = vor.u32 %v3430_v31, %v2996_v30  ;;  %v3117_v43 = vor.u32 %v3459_v41, %v3116_v40  ;;  %v3445_v31 = vld [vmem:[#allocation5 + $0x8c] sm:$0xf]  ;;  %v3217_v41 = vor.u32 %v3481_v37, %v3214_v39  ;;  %v3150_v39 = vld [vmem:[#allocation5 + $0x138] sm:$0xf0] }
  0xb7   :  { %1810 = vmatpush.bf16.msrb.mxu3 %v3225_v35  ;;  %v3752_v54 = vadd.f32 %v324_v46, %v311_v45  ;;  %v3756_v2 = vadd.f32 %v298_v62, %v285_v55  ;;  %v3177_v20 = vor.u32 %v3472_v7, %v3174_v8  ;;  %v2998_v35 = vld [vmem:[#allocation5 + $0x10] sm:$0xf0]  ;;  %v3140_v45 = vld [vmem:[#allocation5 + $0x120] sm:$0xf]  ;;  %v3466_v46 = vld [vmem:[#allocation5 + $0x12c] sm:$0xf0]  ;;  %v3245_v7 = vor.u32 %v3491_v5, %v3244_v4 }
  0xb8   :  { %1769 = vmatpush.bf16.msrb.mxu0 %v3077_v23  ;;  %v3017_v23 = vor.u32 %v3432_v17, %v3014_v19  ;;  %v3141_v48 = vor.u32 %v3466_v46, %v3140_v45  ;;  %v3453_v55 = vld [vmem:[#allocation5 + $0xcc] sm:$0xf]  ;;  %v3460_v62 = vld [vmem:[#allocation5 + $0x104] sm:$0xf]  ;;  %v3228_v19 = vld [vmem:[#allocation5 + $0x1c8] sm:$0xf] }
  0xb9   :  { %1783 = vmatpush.bf16.msrb.mxu1 %v3205_v47  ;;  %v3105_v60 = vor.u32 %v3453_v55, %v3102_v57  ;;  %v3489_v8 = vld [vmem:[#allocation5 + $0x1ec] sm:$0xf]  ;;  %v3182_v5 = vld [vmem:[#allocation5 + $0x178] sm:$0xf0] }
  0xba   :  { %1797 = vmatpush.bf16.msrb.mxu2 %v3081_v26  ;;  %v3468_v26 = vld [vmem:[#allocation5 + $0x144] sm:$0xf]  ;;  %v3465_v37 = vld [vmem:[#allocation5 + $0x12c] sm:$0xf] }
  0xbb   :  { %1811 = vmatpush.bf16.msrb.mxu3 %v3209_v51  ;;  %v3145_v51 = vor.u32 %v3464_v49, %v3142_v50  ;;  %v3196_v50 = vld [vmem:[#allocation5 + $0x188] sm:$0xf] }
  0xbc   :  { %1770 = vmatpush.bf16.msrb.mxu0 %v3061_v38  ;;  %v312_v9 = vpop.f32.mrf.mxu2  ;;  %v3001_v38 = vor.u32 %v3428_v32, %v2998_v35  ;;  %v3070_v32 = vld [vmem:[#allocation5 + $0x98] sm:$0xf0]  ;;  %v3212_v35 = vld [vmem:[#allocation5 + $0x1a8] sm:$0xf] }
  0xbd   :  { %v313_v14 = vadd.f32 %v312_v9, %v102_v29  ;;  %v326_v15 = vpop.f32.mrf.mxu3  ;;  %1784 = vmatpush.bf16.msrb.mxu1 %v3189_v63  ;;  %v3161_v29 = vor.u32 %v3468_v26, %v3158_v28  ;;  %v3126_v63 = vld [vmem:[#allocation5 + $0x110] sm:$0xf0]  ;;  %v3246_v9 = vld [vmem:[#allocation5 + $0x1f8] sm:$0xf0]  ;;  %v3068_v26 = vld [vmem:[#allocation5 + $0x88] sm:$0xf] }
  0xbe   :  { %1798 = vmatpush.bf16.msrb.mxu2 %v3065_v42  ;;  %v3457_v42 = vld [vmem:[#allocation5 + $0xec] sm:$0xf]  ;;  %v3129_v1 = vor.u32 %v3460_v62, %v3126_v63  ;;  %v3249_v11 = vor.u32 %v3489_v8, %v3246_v9  ;;  %v3038_v62 = vld [vmem:[#allocation5 + $0x58] sm:$0xf0]  ;;  %v3435_v8 = vld [vmem:[#allocation5 + $0x34] sm:$0xf0] }
  0xbf   :  { %1812 = vmatpush.bf16.msrb.mxu3 %v3193_v3  ;;  %v3758_v21 = vadd.f32 %v326_v15, %v313_v14  ;;  %v3121_v47 = vor.u32 %v3457_v42, %v3118_v44  ;;  %v2862_v3 = vld [vmem:[%s3851_s3 + $0x8] sm:$0xf0]  ;;  %v3086_v15 = vld [vmem:[#allocation5 + $0xb8] sm:$0xf0]  ;;  %v3052_v42 = vld [vmem:[#allocation5 + $0x68] sm:$0xf] }
  0xc0   :  { %1771 = vmatpush.bf16.msrb.mxu0 %v3045_v56  ;;  %v3101_v56 = vor.u32 %v3455_v53, %v3100_v52  ;;  %v3449_v14 = vld [vmem:[#allocation5 + $0xac] sm:$0xf] }
  0xc1   :  { %1785 = vmatpush.bf16.msrb.mxu1 %v3173_v16  ;;  %v3089_v17 = vor.u32 %v3449_v14, %v3086_v15  ;;  %v3441_v44 = vld [vmem:[#allocation5 + $0x6c] sm:$0xf]  ;;  %v3164_v15 = vld [vmem:[#allocation5 + $0x148] sm:$0xf] }
  0xc2   :  { %1799 = vmatpush.bf16.msrb.mxu2 %v3049_v59  ;;  %v3462_v59 = vld [vmem:[#allocation5 + $0x10c] sm:$0xf0]  ;;  %v3477_v52 = vld [vmem:[#allocation5 + $0x18c] sm:$0xf] }
  0xc3   :  { %1813 = vmatpush.bf16.msrb.mxu3 %v3177_v20  ;;  %v3125_v61 = vor.u32 %v3462_v59, %v3124_v58  ;;  %v3487_v20 = vld [vmem:[#allocation5 + $0x1d4] sm:$0xf0]  ;;  %v3036_v58 = vld [vmem:[#allocation5 + $0x48] sm:$0xf]  ;;  %v3433_v9 = vld [vmem:[#allocation5 + $0x2c] sm:$0xf] }
  0xc4   :  { %1772 = vmatpush.bf16.msrb.mxu0 %v3029_v12  ;;  %v2865_v12 = vor.u32 %v3394_v0, %v2862_v3  ;;  %v3229_v24 = vor.u32 %v3487_v20, %v3228_v19  ;;  %v3439_v59 = vld [vmem:[#allocation5 + $0x54] sm:$0xf0]  ;;  %v3180_v0 = vld [vmem:[#allocation5 + $0x168] sm:$0xf]  ;;  %v3473_v3 = vld [vmem:[#allocation5 + $0x16c] sm:$0xf] }
  0xc5   :  { %1786 = vmatpush.bf16.msrb.mxu1 %v3157_v27  ;;  %v3447_v27 = vld [vmem:[#allocation5 + $0x94] sm:$0xf0] }
  0xc6   :  { %1800 = vmatpush.bf16.msrb.mxu2 %v3033_v10  ;;  %v3084_v10 = vld [vmem:[#allocation5 + $0xa8] sm:$0xf]  ;;  %1347 = vmatmul.bf16.vlgmr.msra.gmra.mxu1 %v2865_v12  ;;  %v3069_v30 = vor.u32 %v3447_v27, %v3068_v26  ;;  %v3431_v27 = vld [vmem:[#allocation5 + $0x14] sm:$0xf0] }
  0xc7   :  { %1814 = vmatpush.bf16.msrb.mxu3 %v3161_v29  ;;  %v3085_v16 = vor.u32 %v3451_v13, %v3084_v10  ;;  %v3004_v26 = vld [vmem:[#allocation5 + $0x8] sm:$0xf] }
  0xc8   :  { %1773 = vmatpush.bf16.msrb.mxu0 %v3013_v22  ;;  %1375 = vmatmul.bf16.vlgmr.msra.gmra.mxu3 %v2865_v12  ;;  %v3485_v22 = vld [vmem:[#allocation5 + $0x1cc] sm:$0xf]  ;;  %v3185_v12 = vor.u32 %v3473_v3, %v3182_v5 }
  0xc9   :  { %1787 = vmatpush.bf16.msrb.mxu1 %v3141_v48  ;;  %v3233_v29 = vor.u32 %v3485_v22, %v3230_v25  ;;  %v3166_v22 = vld [vmem:[#allocation5 + $0x158] sm:$0xf0] }
  0xca   :  { %1801 = vmatpush.bf16.msrb.mxu2 %v3017_v23 }
  0xcb   :  { %1815 = vmatpush.bf16.msrb.mxu3 %v3145_v51  ;;  %v3479_v51 = vld [vmem:[#allocation5 + $0x194] sm:$0xf0] }
  0xcc   :  { %1774 = vmatpush.bf16.msrb.mxu0 %v2997_v33  ;;  %v3774_v28 = vpop.f32.mrf.mxu0  ;;  %v3073_v33 = vor.u32 %v3445_v31, %v3070_v32  ;;  %v3197_v55 = vor.u32 %v3479_v51, %v3196_v50  ;;  %v3005_v31 = vor.u32 %v3431_v27, %v3004_v26  ;;  %v3006_v32 = vld [vmem:[#allocation5 + $0x18] sm:$0xf0] }
  0xcd   :  { %1788 = vmatpush.bf16.msrb.mxu1 %v3125_v61  ;;  %v3772_v23 = vpop.f32.mrf.mxu1  ;;  %v3037_v61 = vor.u32 %v3439_v59, %v3036_v58 }
  0xce   :  { %1802 = vmatpush.bf16.msrb.mxu2 %v3001_v38  ;;  %v3213_v38 = vor.u32 %v3483_v36, %v3212_v35  ;;  %v3148_v35 = vld [vmem:[#allocation5 + $0x128] sm:$0xf]  ;;  %v3467_v36 = vld [vmem:[#allocation5 + $0x134] sm:$0xf0] }
  0xcf   :  { %1816 = vmatpush.bf16.msrb.mxu3 %v3129_v1  ;;  %v3475_v1 = vld [vmem:[#allocation5 + $0x174] sm:$0xf0] }
  0xd0   :  { %1823 = vmatpush.bf16.msra.mxu0 %v3117_v43  ;;  %v3443_v43 = vld [vmem:[#allocation5 + $0x74] sm:$0xf0]  ;;  %v3181_v4 = vor.u32 %v3475_v1, %v3180_v0 }
  0xd1   :  { %1837 = vmatpush.bf16.msra.mxu1 %v3245_v7  ;;  %v3053_v46 = vor.u32 %v3443_v43, %v3052_v42  ;;  %v3020_v7 = vld [vmem:[#allocation5 + $0x28] sm:$0xf]  ;;  %v3463_v43 = vld [vmem:[#allocation5 + $0x114] sm:$0xf0] }
  0xd2   :  { %1851 = vmatpush.bf16.msra.mxu2 %v3121_v47  ;;  %v3054_v47 = vld [vmem:[#allocation5 + $0x78] sm:$0xf0]  ;;  %v3021_v10 = vor.u32 %v3435_v8, %v3020_v7  ;;  %v3132_v42 = vld [vmem:[#allocation5 + $0x108] sm:$0xf]  ;;  %v891_v7 = vperm.slane %v3745_v18, 3 }
  0xd3   :  { %1865 = vmatpush.bf16.msra.mxu3 %v3249_v11  ;;  %v3057_v49 = vor.u32 %v3441_v44, %v3054_v47  ;;  %v3022_v11 = vld [vmem:[#allocation5 + $0x38] sm:$0xf0]  ;;  %v3461_v44 = vld [vmem:[#allocation5 + $0x10c] sm:$0xf] }
  0xd4   :  { %1824 = vmatpush.bf16.msra.mxu0 %v3101_v56  ;;  %v3776_v40 = vpop.f32.mrf.mxu2  ;;  %v3782_v53 = vpop.f32.mrf.mxu0  ;;  %v3198_v56 = vld [vmem:[#allocation5 + $0x198] sm:$0xf0]  ;;  %v3025_v14 = vor.u32 %v3433_v9, %v3022_v11  ;;  %v365_v11 = vperm.slane %v3745_v18, 1 }
  0xd5   :  { %1838 = vmatpush.bf16.msra.mxu1 %v3229_v24  ;;  %v3778_v45 = vpop.f32.mrf.mxu3  ;;  %v3780_v48 = vpop.f32.mrf.mxu1  ;;  %v3201_v57 = vor.u32 %v3477_v52, %v3198_v56  ;;  %v3134_v47 = vld [vmem:[#allocation5 + $0x118] sm:$0xf0] }
  0xd6   :  { %1852 = vmatpush.bf16.msra.mxu2 %v3105_v60  ;;  %v3437_v60 = vld [vmem:[#allocation5 + $0x4c] sm:$0xf]  ;;  %v3137_v50 = vor.u32 %v3461_v44, %v3134_v47  ;;  %v1153_v44 = vperm.slane %v3739_v6, 4  ;;  %v1879_v47 = vperm.slane %v3739_v6, 5 }
  0xd7   :  { %1866 = vmatpush.bf16.msra.mxu3 %v3233_v29  ;;  %v3041_v63 = vor.u32 %v3437_v60, %v3038_v62  ;;  %v3429_v29 = vld [vmem:[#allocation5 + $0xc] sm:$0xf]  ;;  %v890_v60 = vperm.slane %v3739_v6, 3  ;;  %v627_v62 = vperm.slane %v3739_v6, 2 }
  0xd8   :  { %1825 = vmatpush.bf16.msra.mxu0 %v3085_v16  ;;  %v3471_v16 = vld [vmem:[#allocation5 + $0x154] sm:$0xf0] }
  0xd9   :  { %1839 = vmatpush.bf16.msra.mxu1 %v3213_v38  ;;  %v3165_v20 = vor.u32 %v3471_v16, %v3164_v15  ;;  %v3149_v38 = vor.u32 %v3467_v36, %v3148_v35 }
  0xda   :  { %1853 = vmatpush.bf16.msra.mxu2 %v3089_v17  ;;  %v3469_v17 = vld [vmem:[#allocation5 + $0x14c] sm:$0xf] }
  0xdb   :  { %1867 = vmatpush.bf16.msra.mxu3 %v3217_v41  ;;  %v3169_v25 = vor.u32 %v3469_v17, %v3166_v22  ;;  %v3153_v41 = vor.u32 %v3465_v37, %v3150_v39 }
  0xdc   :  { %1826 = vmatpush.bf16.msra.mxu0 %v3069_v30  ;;  %v3784_v13 = vpop.f32.mrf.mxu2 }
  0xdd   :  { %1840 = vmatpush.bf16.msra.mxu1 %v3197_v55  ;;  %v3786_v19 = vpop.f32.mrf.mxu3 }
  0xde   :  { %1854 = vmatpush.bf16.msra.mxu2 %v3073_v33  ;;  %v3009_v33 = vor.u32 %v3429_v29, %v3006_v32 }
  0xdf   :  { %1868 = vmatpush.bf16.msra.mxu3 %v3201_v57 }
  0xe0   :  { %1827 = vmatpush.bf16.msra.mxu0 %v3053_v46  ;;  %v3133_v46 = vor.u32 %v3463_v43, %v3132_v42 }
  0xe1   :  { %1841 = vmatpush.bf16.msra.mxu1 %v3181_v4 }
  0xe2   :  { %1855 = vmatpush.bf16.msra.mxu2 %v3057_v49 }
  0xe3   :  { %1869 = vmatpush.bf16.msra.mxu3 %v3185_v12 }
  0xe4   :  { %1828 = vmatpush.bf16.msra.mxu0 %v3037_v61  ;;  %v364_v61 = vperm.slane %v3739_v6, 1 }
  0xe5   :  { %1842 = vmatpush.bf16.msra.mxu1 %v3165_v20 }
  0xe6   :  { %1856 = vmatpush.bf16.msra.mxu2 %v3041_v63  ;;  %v546_v5 = vadd.f32 %v3774_v28, %v364_v61  ;;  %v574_v28 = vadd.f32 %v3776_v40, %v365_v11  ;;  %v576_v40 = vadd.f32 %v3784_v13, %v365_v11 }
  0xe7   :  { %1870 = vmatpush.bf16.msra.mxu3 %v3169_v25 }
  0xe8   :  { %1829 = vmatpush.bf16.msra.mxu0 %v3021_v10  ;;  %v560_v16 = vadd.f32 %v3772_v23, %v546_v5  ;;  %v588_v32 = vadd.f32 %v3778_v45, %v574_v28  ;;  %v548_v23 = vadd.f32 %v3782_v53, %v364_v61  ;;  %v590_v45 = vadd.f32 %v3786_v19, %v576_v40 }
  0xe9   :  { %1843 = vmatpush.bf16.msra.mxu1 %v3149_v38 }
  0xea   :  { %1857 = vmatpush.bf16.msra.mxu2 %v3025_v14  ;;  %v628_v14 = vperm.slane %v3745_v18, 2  ;;  %v562_v35 = vadd.f32 %v3780_v48, %v548_v23 }
  0xeb   :  { %1871 = vmatpush.bf16.msra.mxu3 %v3153_v41 }
  0xec   :  { %v808_v30 = vpop.f32.mrf.mxu0  ;;  %1830 = vmatpush.bf16.msra.mxu0 %v3005_v31 }
  0xed   :  { %v822_v24 = vpop.f32.mrf.mxu1  ;;  %1844 = vmatpush.bf16.msra.mxu1 %v3133_v46  ;;  %v809_v12 = vadd.f32 %v808_v30, %v627_v62 }
  0xee   :  { %1858 = vmatpush.bf16.msra.mxu2 %v3009_v33 }
  0xef   :  { %1872 = vmatpush.bf16.msra.mxu3 %v3137_v50  ;;  %v823_v17 = vadd.f32 %v822_v24, %v809_v12 }
  0xf4   :  { %v836_v49 = vpop.f32.mrf.mxu2  ;;  %v810_v55 = vpop.f32.mrf.mxu0 }
  0xf5   :  { %v850_v51 = vpop.f32.mrf.mxu3  ;;  %v824_v52 = vpop.f32.mrf.mxu1  ;;  %v837_v26 = vadd.f32 %v836_v49, %v628_v14  ;;  %v811_v24 = vadd.f32 %v810_v55, %v627_v62 }
  0xf7   :  { %v851_v33 = vadd.f32 %v850_v51, %v837_v26  ;;  %v825_v36 = vadd.f32 %v824_v52, %v811_v24  ;;  %v1880_v52 = vperm.slane %v3745_v18, 5 }
  0xfc   :  { %v838_v56 = vpop.f32.mrf.mxu2 }
  0xfd   :  { %v852_v57 = vpop.f32.mrf.mxu3  ;;  %v839_v37 = vadd.f32 %v838_v56, %v628_v14 }
  0xff   :  { %v853_v38 = vadd.f32 %v852_v57, %v839_v37 }
 0x10c   :  { %v1071_v58 = vpop.f32.mrf.mxu0 }
 0x10d   :  { %v1085_v59 = vpop.f32.mrf.mxu1  ;;  %v1072_v63 = vadd.f32 %v1071_v58, %v890_v60 }
 0x10f   :  { %v1086_v9 = vadd.f32 %v1085_v59, %v1072_v63 }
 0x114   :  { %v1099_v0 = vpop.f32.mrf.mxu2  ;;  %v1073_v3 = vpop.f32.mrf.mxu0 }
 0x115   :  { %v1113_v1 = vpop.f32.mrf.mxu3  ;;  %v1074_v4 = vadd.f32 %v1073_v3, %v890_v60  ;;  %v1087_v8 = vpop.f32.mrf.mxu1  ;;  %v1100_v20 = vadd.f32 %v1099_v0, %v891_v7 }
 0x117   :  { %v1088_v10 = vadd.f32 %v1087_v8, %v1074_v4  ;;  %v1114_v29 = vadd.f32 %v1113_v1, %v1100_v20 }
 0x119   :  { %v1381_v15 = vpack.c.bf16 %v1088_v10, %v1086_v9 }
 0x11b   :  { %1775 = vmatmul.bf16.vlgmr.msrb.gmra.mxu0 %v1381_v15  ;;  %1803 = vmatmul.bf16.vlgmr.msrb.gmra.mxu2 %v1381_v15 }
 0x11c   :  { %v1101_v22 = vpop.f32.mrf.mxu2  ;;  %1906 = vmatpush.xpose.msrb.mxu0 %v560_v16  ;;  %1961 = vmatpush.msrb.mxu2 %v823_v17 }
 0x11d   :  { %v1102_v25 = vadd.f32 %v1101_v22, %v891_v7  ;;  %v1115_v27 = vpop.f32.mrf.mxu3 }
 0x11f   :  { %v1116_v30 = vadd.f32 %v1115_v27, %v1102_v25 }
 0x121   :  { %v1382_v31 = vpack.c.bf16 %v1116_v30, %v1114_v29 }
 0x123   :  { %1789 = vmatmul.bf16.vlgmr.msrb.gmra.mxu1 %v1382_v31  ;;  %1817 = vmatmul.bf16.vlgmr.msrb.gmra.mxu3 %v1382_v31 }
 0x124   :  { %1926 = vmatpush.xpose.msrb.mxu1 %v588_v32  ;;  %1981 = vmatpush.msrb.mxu3 %v851_v33 }
 0x12b   :  { %1831 = vmatmul.bf16.vlgmr.msra.gmra.mxu0 %v1381_v15  ;;  %1859 = vmatmul.bf16.vlgmr.msra.gmra.mxu2 %v1381_v15 }
 0x12c   :  { %2003 = vmatpush.xpose.msra.mxu0 %v562_v35  ;;  %2057 = vmatpush.msra.mxu2 %v825_v36  ;;  %v1334_v48 = vpop.f32.mrf.mxu0 }
 0x12d   :  { %v1335_v50 = vadd.f32 %v1334_v48, %v1153_v44 }
 0x133   :  { %1845 = vmatmul.bf16.vlgmr.msra.gmra.mxu1 %v1382_v31  ;;  %1873 = vmatmul.bf16.vlgmr.msra.gmra.mxu3 %v1382_v31 }
 0x134   :  { %2023 = vmatpush.xpose.msra.mxu1 %v590_v45  ;;  %2077 = vmatpush.msra.mxu3 %v853_v38  ;;  %v1336_v39 = vpop.f32.mrf.mxu0  ;;  %v1362_v13 = vpop.f32.mrf.mxu2 }
 0x135   :  { %v1337_v6 = vadd.f32 %v1336_v39, %v1153_v44 }
 0x13b   :  { %1907 = vmatmul.f32.vlgmr.msrb.gmra.mxu0 %v3750_v34 }
 0x13c   :  { %v1364_v43 = vpop.f32.mrf.mxu2 }
 0x143   :  { %1927 = vmatmul.f32.vlgmr.msrb.gmra.mxu1 %v3752_v54  ;;  %2004 = vmatmul.f32.vlgmr.msra.gmra.mxu0 %v3756_v2  ;;  %v1348_v53 = vpop.f32.mrf.mxu1 }
 0x144   :  { %v1349_v55 = vadd.f32 %v1348_v53, %v1335_v50 }
 0x14b   :  { %2024 = vmatmul.f32.vlgmr.msra.gmra.mxu1 %v3758_v21  ;;  %v1376_v41 = vpop.f32.mrf.mxu3  ;;  %v1350_v42 = vpop.f32.mrf.mxu1  ;;  %v1154_v21 = vperm.slane %v3745_v18, 4 }
 0x14c   :  { %v1351_v1 = vadd.f32 %v1350_v42, %v1337_v6 }
 0x14d   :  { %v1363_v58 = vadd.f32 %v1362_v13, %v1154_v21  ;;  %v1365_v12 = vadd.f32 %v1364_v43, %v1154_v21 }
 0x14f   :  { %v1377_v0 = vadd.f32 %v1376_v41, %v1363_v58 }
 0x153   :  { %v1378_v46 = vpop.f32.mrf.mxu3 }
 0x154   :  { %v1379_v10 = vadd.f32 %v1378_v46, %v1365_v12 }
 0x198   :  { %v1776_v19 = vpop.f32.mrf.mxu0 }
 0x19e   :  { %v1804_v51 = vpop.f32.mrf.mxu2 }
 0x1a0   :  { %v1790_v34 = vpop.f32.mrf.mxu1  ;;  %v1778_v54 = vpop.f32.mrf.mxu0 }
 0x1a1   :  { %v1791_v49 = vadd.f32 %v1790_v34, %v1776_v19 }
 0x1a3   :  { %v1881_v2 = vadd.f32 %v1879_v47, %v1791_v49 }
 0x1a5   :  { %2099 = vmatpush.xpose.msrb.mxu0 %v1881_v2 }
 0x1a6   :  { %v1818_v56 = vpop.f32.mrf.mxu3  ;;  %v1806_v3 = vpop.f32.mrf.mxu2 }
 0x1a7   :  { %v1819_v57 = vadd.f32 %v1818_v56, %v1804_v51 }
 0x1a8   :  { %v1792_v59 = vpop.f32.mrf.mxu1  ;;  %2100 = vmatmul.f32.vlgmr.msrb.gmra.mxu0 %v1349_v55  ;;  %v1832_v62 = vpop.f32.mrf.mxu0 }
 0x1a9   :  { %v1882_v60 = vadd.f32 %v1880_v52, %v1819_v57  ;;  %v1793_v61 = vadd.f32 %v1792_v59, %v1778_v54  ;;  %v1886_v57 = vperm.slane %v3745_v18, 6 }
 0x1ab   :  { %v1883_v63 = vadd.f32 %v1879_v47, %v1793_v61  ;;  %2119 = vmatpush.xpose.msrb.mxu1 %v1882_v60 }
 0x1ad   :  { %2195 = vmatpush.xpose.msra.mxu0 %v1883_v63 }
 0x1ae   :  { %v1820_v4 = vpop.f32.mrf.mxu3  ;;  %2120 = vmatmul.f32.vlgmr.msrb.gmra.mxu1 %v1377_v0  ;;  %v1860_v51 = vpop.f32.mrf.mxu2 }
 0x1af   :  { %v1821_v5 = vadd.f32 %v1820_v4, %v1806_v3 }
 0x1b0   :  { %v1846_v7 = vpop.f32.mrf.mxu1  ;;  %2196 = vmatmul.f32.vlgmr.msra.gmra.mxu0 %v1351_v1  ;;  %v1834_v11 = vpop.f32.mrf.mxu0 }
 0x1b1   :  { %v1884_v8 = vadd.f32 %v1880_v52, %v1821_v5  ;;  %v3810_v9 = vadd.f32 %v1846_v7, %v1832_v62  ;;  %v3516_v52 = vld [vmem:[%s3855_s7] sm:$0xff]  ;;  %s3627_s7 = smov [#allocation7]  }
 0x1b2   :  { %v1885_v55 = vperm.slane %v3516_v52, 6  ;;  %s2280_s18 = sshll.u32 %s3627_s7, 4  ;;  %s2281_s18 = int_to_ptr.vmem [resolvable:$true] %s2280_s18 }
 0x1b3   :  { %2215 = vmatpush.xpose.msra.mxu1 %v1884_v8 }
 0x1b4   :  { %v1887_v61 = vadd.f32 %v1885_v55, %v3810_v9 }
 0x1b6   :  { %2216 = vmatmul.f32.vlgmr.msra.gmra.mxu1 %v1379_v10  ;;  %v1874_v2 = vpop.f32.mrf.mxu3  ;;  %v1862_v63 = vpop.f32.mrf.mxu2 }
 0x1b7   :  { %v1875_v56 = vadd.f32 %v1874_v2, %v1860_v51 }
 0x1b8   :  { %v1848_v14 = vpop.f32.mrf.mxu1  ;;  %v1908_v16 = vpop.f32.mrf.mxu0 }
 0x1b9   :  { %v3812_v15 = vadd.f32 %v1848_v14, %v1834_v11  ;;  %v1888_v6 = vadd.f32 %v1886_v57, %v1875_v56 }
 0x1bb   :  { %v1889_v18 = vadd.f32 %v1885_v55, %v3812_v15 }
 0x1be   :  { %v1876_v62 = vpop.f32.mrf.mxu3 }
 0x1bf   :  { %v1877_v0 = vadd.f32 %v1876_v62, %v1862_v63 }
 0x1c0   :  { %v1928_v17 = vpop.f32.mrf.mxu1  ;;  %v2005_v25 = vpop.f32.mrf.mxu0 }
 0x1c1   :  { %v1929_v20 = vadd.f32 %v1928_v17, %v1908_v16  ;;  %v1890_v4 = vadd.f32 %v1886_v57, %v1877_v0 }
 0x1c3   :  { %v1932_v22 = vsel %vm1931_vm0, %v1929_v20, -inf }
 0x1c4   :  { %1933 = vmax.xlane.f32.xlu0 %v1932_v22 }
 0x1c8   :  { %v2025_v28 = vpop.f32.mrf.mxu1 }
 0x1c9   :  { %v2026_v26 = vadd.f32 %v2025_v28, %v2005_v25 }
 0x1cb   :  { %v2028_v27 = vsel %vm1931_vm0, %v2026_v26, -inf }
 0x1cc   :  { %2029 = vmax.xlane.f32.xlu0 %v2028_v27 }
 0x225   :  { %v2101_v29 = vpop.f32.mrf.mxu0 }
 0x22b   :  { %v2121_v30 = vpop.f32.mrf.mxu1 }
 0x22c   :  { %v2122_v31 = vadd.f32 %v2121_v30, %v2101_v29 }
 0x22d   :  { %v2197_v33 = vpop.f32.mrf.mxu0 }
 0x22e   :  { %v2124_v32 = vsel %vm1931_vm0, %v2122_v31, -inf }
 0x22f   :  { %2125 = vmax.xlane.f32.xlu1 %v2124_v32 }
 0x233   :  { %v2217_v23 = vpop.f32.mrf.mxu1 }
 0x234   :  { %v2218_v24 = vadd.f32 %v2217_v23, %v2197_v33 }
 0x236   :  { %v2220_v35 = vsel %vm1931_vm0, %v2218_v24, -inf }
 0x237   :  { %2221 = vmax.xlane.f32.xlu1 %v2220_v35  ;;  %v1934_v36 = vpop.xlane.xlu0 %1933 }
 0x238   :  { %v1935_v40 = vsub.f32 %v1929_v20, %v1934_v36 }
 0x23a   :  { %v1936_v37 = vmul.f32 1.442695, %v1935_v40 }
 0x23c   :  { %3500 = vpow2.f32 %v1936_v37 }
 0x23f   :  { %v2030_v45 = vpop.xlane.xlu0 %2029 }
 0x240   :  { %v2031_v38 = vsub.f32 %v2026_v26, %v2030_v45 }
 0x242   :  { %v3501_v48 = vpop.eup %3500  ;;  %v2032_v53 = vmul.f32 1.442695, %v2031_v38 }
 0x243   :  { %v1938_v39 = vsel %vm1931_vm0, %v3501_v48, 0.0 }
 0x244   :  { %3502 = vpow2.f32 %v2032_v53  ;;  %1939 = vadd.xlane.f32.xlu2 %v1938_v39 }
 0x24a   :  { %v3503_v13 = vpop.eup %3502 }
 0x24b   :  { %v2034_v41 = vsel %vm1931_vm0, %v3503_v13, 0.0 }
 0x24c   :  { %2035 = vadd.xlane.f32.xlu2 %v2034_v41 }
 0x2a2   :  { %v2126_v42 = vpop.xlane.xlu1 %2125 }
 0x2a3   :  { %v2127_v19 = vsub.f32 %v2122_v31, %v2126_v42 }
 0x2a5   :  { %v2128_v43 = vmul.f32 1.442695, %v2127_v19 }
 0x2a7   :  { %3504 = vpow2.f32 %v2128_v43 }
 0x2aa   :  { %v2222_v44 = vpop.xlane.xlu1 %2221 }
 0x2ab   :  { %v2223_v46 = vsub.f32 %v2218_v24, %v2222_v44 }
 0x2ad   :  { %v3505_v47 = vpop.eup %3504  ;;  %v2224_v34 = vmul.f32 1.442695, %v2223_v46 }
 0x2ae   :  { %v2130_v49 = vsel %vm1931_vm0, %v3505_v47, 0.0 }
 0x2af   :  { %3506 = vpow2.f32 %v2224_v34  ;;  %2131 = vadd.xlane.f32.xlu0 %v2130_v49 }
 0x2b5   :  { %v3507_v54 = vpop.eup %3506 }
 0x2b6   :  { %v2226_v50 = vsel %vm1931_vm0, %v3507_v54, 0.0 }
 0x2b7   :  { %2227 = vadd.xlane.f32.xlu1 %v2226_v50  ;;  %v1940_v21 = vpop.xlane.xlu2 %1939 }
 0x2b8   :  { %3508 = vrcp.f32 %v1940_v21 }
 0x2be   :  { %v3509_v58 = vpop.eup %3508 }
 0x2bf   :  { %v1942_v59 = vmul.f32 %v3509_v58, %v3501_v48  ;;  %v2036_v60 = vpop.xlane.xlu2 %2035 }
 0x2c0   :  { %3510 = vrcp.f32 %v2036_v60 }
 0x2c1   :  { %3250 = vmatmul.msk.f32.vlgmr.msrb.gmra.mxu2 %vm1931_vm0, %v1942_v59  ;;  %3251 = vmatmul.msk.f32.vlgmr.msrb.gmra.mxu3 %vm1931_vm0, %v1942_v59 }
 0x2c2   :  { %2153 = vmatpush.msrb.mxu2 %v1887_v61  ;;  %2173 = vmatpush.msrb.mxu3 %v1888_v6 }
 0x2c6   :  { %v3511_v1 = vpop.eup %3510 }
 0x2c7   :  { %v2038_v3 = vmul.f32 %v3511_v1, %v3503_v13 }
 0x2c9   :  { %3252 = vmatmul.msk.f32.vlgmr.msra.gmra.mxu2 %vm1931_vm0, %v2038_v3  ;;  %3253 = vmatmul.msk.f32.vlgmr.msra.gmra.mxu3 %vm1931_vm0, %v2038_v3 }
 0x2ca   :  { %2249 = vmatpush.msra.mxu2 %v1889_v18  ;;  %2269 = vmatpush.msra.mxu3 %v1890_v4 }
 0x322   :  { %v2132_v5 = vpop.xlane.xlu0 %2131 }
 0x323   :  { %3512 = vrcp.f32 %v2132_v5 }
 0x329   :  { %v3513_v12 = vpop.eup %3512 }
 0x32a   :  { %v2134_v7 = vmul.f32 %v3513_v12, %v3505_v47  ;;  %v2228_v8 = vpop.xlane.xlu1 %2227 }
 0x32b   :  { %3514 = vrcp.f32 %v2228_v8 }
 0x32c   :  { %3254 = vmatmul.msk.f32.vlgmr.msrb.gmra.mxu2 %vm1931_vm0, %v2134_v7  ;;  %3255 = vmatmul.msk.f32.vlgmr.msrb.gmra.mxu3 %vm1931_vm0, %v2134_v7 }
 0x331   :  { %v3515_v9 = vpop.eup %3514 }
 0x332   :  { %v2230_v10 = vmul.f32 %v3515_v9, %v3507_v54 }
 0x334   :  { %3256 = vmatmul.msk.f32.vlgmr.msra.gmra.mxu2 %vm1931_vm0, %v2230_v10  ;;  %3257 = vmatmul.msk.f32.vlgmr.msra.gmra.mxu3 %vm1931_vm0, %v2230_v10 }
 0x344   :  { %v1963_v11 = vpop.f32.mrf.mxu2  ;;  %v1983_v14 = vpop.f32.mrf.mxu3 }
 0x345   :  { %1986 = vst [vmem:[#allocation7] sm:$0xff] %v1963_v11 }
 0x346   :  { %1987 = vst [vmem:[#allocation7 + $0x8] sm:$0xff] %v1983_v14 }
 0x34c   :  { %v2059_v15 = vpop.f32.mrf.mxu2  ;;  %v2079_v16 = vpop.f32.mrf.mxu3 }
 0x34d   :  { %2082 = vst [vmem:[#allocation7 + $0x10] sm:$0xff] %v2059_v15 }
 0x34e   :  { %2083 = vst [vmem:[#allocation7 + $0x18] sm:$0xff] %v2079_v16 }
 0x34f   :  { %2288 = dma.vmem_to_hbm [thread:$0]  %s2281_s18, 512, %s2283_s5, [#allocation4], %s3625_s21, %s3625_s21, %s3626_s22  }
 0x3af   :  { %v2155_v17 = vpop.f32.mrf.mxu2  ;;  %v2175_v20 = vpop.f32.mrf.mxu3 }
 0x3b0   :  { %2178 = vst [vmem:[#allocation8] sm:$0xff] %v2155_v17 }
 0x3b1   :  { %2179 = vst [vmem:[#allocation8 + $0x8] sm:$0xff] %v2175_v20 }
 0x3b7   :  { %v2251_v22 = vpop.f32.mrf.mxu2  ;;  %v2271_v25 = vpop.f32.mrf.mxu3 }
 0x3b8   :  { %2274 = vst [vmem:[#allocation8 + $0x10] sm:$0xff] %v2251_v22 }
 0x3b9   :  { %2275 = vst [vmem:[#allocation8 + $0x18] sm:$0xff] %v2271_v25 }
 0x3ba   :  { %2301 = dma.vmem_to_hbm [thread:$0]  %s2294_s6, 512, %s2296_s8, [#allocation9], %s3625_s21, %s3625_s21, %s3626_s22  }
 0x3bb   :  { %3617 = dma.done.wait [#allocation4], 512  }
 0x3bc   :  { %3618 = vsyncadd [#allocation4], 4294966784 }
 0x3bd   :  { %3619 = dma.done.wait [#allocation9], 512  }
 0x3be   :  { %3620 = vsyncadd [#allocation9], 4294966784 }
 0x3bf   :  { %2310 = vsyncpa [#allocation3], 1 }
 0x3c0   :  { %2311 = vsyncpa [#allocation6], 1 }
 0x3c1   :  { %2312 = vsyncpa [#allocation4], 1 }
 0x3c2   :  { %2313 = vsyncpa [#allocation9], 1 }

</bundles_post_ra>
